<compile_context>
chip_gen: v5e
topology: v5e:2x2
jax: 0.10.0
libtpu: 0.0.40
codegen_flags: <defaults>
</compile_context>

<pallas_src>
import math

import jax
import jax.numpy as jnp
from jax import lax
from jax.experimental import pallas as pl
from jax.experimental.pallas import tpu as pltpu  # noqa: F401  (TPU backend)

# ----------------------------- model sizes ---------------------------------
B, L, H = 2, 8, 32          # batch, seq len, hidden size
NH, DH = 4, 8               # attention heads, head dim (NH * DH == H)
FFN = 64                    # feed-forward inner dim
NUM_LAYERS = 2
VOCAB = 50
LN_EPS = 1e-12
BL = B * L                  # batch folded into the sublane (row) axis
NEG_INF = -1e9


def _layernorm(x, g, b):
    mu = jnp.mean(x, axis=-1, keepdims=True)
    var = jnp.mean((x - mu) ** 2, axis=-1, keepdims=True)
    return (x - mu) * lax.rsqrt(var + LN_EPS) * g + b


# -------------- single fused kernel: all encoder layers + QA heads ----------
def reader_kernel(x_ref, qseg_ref, kseg_ref,
                  wqkv_ref, bqkv_ref, wo_ref, bo_ref, ln1g_ref, ln1b_ref,
                  w1_ref, b1_ref, w2_ref, b2_ref, ln2g_ref, ln2b_ref,
                  whead_ref, bhead_ref,
                  out_ref):
    x = x_ref[...]                                          # (BL, H) f32

    # Block-diagonal (per-batch) + key-padding additive attention bias, built
    # once from two tiny segment-id vectors (VPU only; no (B, L, L) DMA).
    bias = jnp.where(qseg_ref[...] == kseg_ref[...], 0.0, NEG_INF)   # (BL, BL)

    scale = 1.0 / math.sqrt(DH)

    for layer in range(NUM_LAYERS):                         # fully unrolled
        # Fused Q|K|V projection: one (BL, H) @ (H, 3H) matmul + one bias add.
        qkv = (jnp.dot(x, wqkv_ref[layer], preferred_element_type=jnp.float32)
               + bqkv_ref[layer])                           # (BL, 3H)
        q = qkv[:, 0:H]
        k = qkv[:, H:2 * H]
        v = qkv[:, 2 * H:3 * H]

        # Short static per-head loop (NH=4) over lane slices.  A fully batched
        # head dot_general would require minor-dim reshapes/transposes that are
        # not guaranteed to lower in Mosaic at these shapes.
        ctx_heads = []
        for h in range(NH):
            sl = slice(h * DH, (h + 1) * DH)
            s = lax.dot_general(q[:, sl], k[:, sl],
                                (((1,), (1,)), ((), ())),
                                preferred_element_type=jnp.float32)
            s = s * scale + bias                            # (BL, BL)
            m = jnp.max(s, axis=-1, keepdims=True)
            p = jnp.exp(s - m)
            p = p * pl.reciprocal(jnp.sum(p, axis=-1, keepdims=True), approx=True)
            ctx_heads.append(jnp.dot(p, v[:, sl],
                                     preferred_element_type=jnp.float32))
        ctx = jnp.concatenate(ctx_heads, axis=-1)           # (BL, H)

        attn = (jnp.dot(ctx, wo_ref[layer], preferred_element_type=jnp.float32)
                + bo_ref[layer])
        h1 = _layernorm(x + attn, ln1g_ref[layer], ln1b_ref[layer])
        # TODO(synk): HF BERT uses exact erf-GELU; tanh-approx GELU is used here
        # since an erf lowering is not guaranteed in Mosaic.
        ff = jax.nn.gelu(jnp.dot(h1, w1_ref[layer],
                                 preferred_element_type=jnp.float32)
                         + b1_ref[layer])
        ff = (jnp.dot(ff, w2_ref[layer], preferred_element_type=jnp.float32)
              + b2_ref[layer])
        x = _layernorm(h1 + ff, ln2g_ref[layer], ln2b_ref[layer])

    # Fused QA heads: columns = [start_logit, end_logit, classifier_logit],
    # one lane-dense store for the whole batch.
    out_ref[...] = (jnp.dot(x, whead_ref[...], preferred_element_type=jnp.float32)
                    + bhead_ref[...])                       # (BL, 3)


# ------------------------------- wrapper -------------------------------------
_WEIGHT_KEYS = ("wqkv", "bqkv", "wo", "bo", "ln1g", "ln1b",
                "w1", "b1", "w2", "b2", "ln2g", "ln2b", "whead", "bhead")


def forward(input_ids, attention_mask, params):
    # --- embeddings (gather + layernorm: plain-JAX glue) ---
    x = params["tok_emb"][input_ids] + params["pos_emb"][None, :, :]
    x = _layernorm(x, params["emb_ln_g"], params["emb_ln_b"])
    x = x.reshape(BL, H).astype(jnp.float32)                # fold batch into rows

    # Segment ids: query rows always carry batch_id+1; keys carry 0 if padded.
    # attend[i, j] = (qseg[i] == kseg[j]) => same batch AND key j not padded.
    batch_ids = jnp.repeat(jnp.arange(B, dtype=jnp.float32) + 1.0, L)   # (BL,)
    qseg = batch_ids.reshape(BL, 1)
    kseg = (batch_ids * attention_mask.reshape(BL).astype(jnp.float32)).reshape(1, BL)

    weights = [params[k] for k in _WEIGHT_KEYS]
    logits = pl.pallas_call(
        reader_kernel,
        out_shape=jax.ShapeDtypeStruct((BL, 3), jnp.float32),
    )(x, qseg, kseg, *weights)

    logits = logits.reshape(B, L, 3)
    start_logits = logits[:, :, 0]                          # (B, L)
    end_logits = logits[:, :, 1]                            # (B, L)
    classifier_logits = logits[:, 0, 2:3]                   # (B, 1)  (CLS token)
    return classifier_logits, start_logits, end_logits


# --------------------------- deterministic init ------------------------------
def init_params(key):
    def dense(k, fan_in, fan_out):
        k1, k2 = jax.random.split(k)
        w = jax.random.normal(k1, (fan_in, fan_out), jnp.float32) * 0.02
        b = jax.random.normal(k2, (1, fan_out), jnp.float32) * 0.02
        return w, b

    keys = jax.random.split(key, 4 + NUM_LAYERS)
    params = {
        "tok_emb": jax.random.normal(keys[0], (VOCAB, H), jnp.float32) * 0.02,
        "pos_emb": jax.random.normal(keys[1], (L, H), jnp.float32) * 0.02,
        "emb_ln_g": jnp.ones((1, H), jnp.float32),
        "emb_ln_b": jnp.zeros((1, H), jnp.float32),
    }

    stacked = {k: [] for k in ("wqkv", "bqkv", "wo", "bo", "w1", "b1", "w2", "b2")}
    for i in range(NUM_LAYERS):
        lk = jax.random.split(keys[2 + i], 6)
        wq, bq = dense(lk[0], H, H)
        wk, bk = dense(lk[1], H, H)
        wv, bv = dense(lk[2], H, H)
        wo, bo = dense(lk[3], H, H)
        w1, b1 = dense(lk[4], H, FFN)
        w2, b2 = dense(lk[5], FFN, H)
        stacked["wqkv"].append(jnp.concatenate([wq, wk, wv], axis=1))   # (H, 3H)
        stacked["bqkv"].append(jnp.concatenate([bq, bk, bv], axis=1))   # (1, 3H)
        stacked["wo"].append(wo)
        stacked["bo"].append(bo)
        stacked["w1"].append(w1)
        stacked["b1"].append(b1)
        stacked["w2"].append(w2)
        stacked["b2"].append(b2)
    for k, v in stacked.items():
        params[k] = jnp.stack(v)                            # (NUM_LAYERS, ...)
    params["ln1g"] = jnp.ones((NUM_LAYERS, 1, H), jnp.float32)
    params["ln1b"] = jnp.zeros((NUM_LAYERS, 1, H), jnp.float32)
    params["ln2g"] = jnp.ones((NUM_LAYERS, 1, H), jnp.float32)
    params["ln2b"] = jnp.zeros((NUM_LAYERS, 1, H), jnp.float32)

    qk = jax.random.split(keys[2 + NUM_LAYERS], 2)
    wqa, bqa = dense(qk[0], H, 2)      # qa_outputs:    Linear(H, 2)
    wcls, bcls = dense(qk[1], H, 1)    # qa_classifier: Linear(H, 1)
    params["whead"] = jnp.concatenate([wqa, wcls], axis=1)  # (H, 3)
    params["bhead"] = jnp.concatenate([bqa, bcls], axis=1)  # (1, 3)
    return params


if __name__ == "__main__":
    root = jax.random.PRNGKey(0)
    pkey, ikey = jax.random.split(root)
    params = init_params(pkey)

    input_ids = jax.random.randint(ikey, (B, L), 0, VOCAB)
    attention_mask = jnp.ones((B, L), jnp.float32).at[1, 6:].set(0.0)  # pad tail

    fwd = jax.jit(forward)
    classifier_logits, start_logits, end_logits = fwd(
        input_ids, attention_mask, params)
    jax.block_until_ready((classifier_logits, start_logits, end_logits))

    assert classifier_logits.shape == (B, 1)
    assert start_logits.shape == (B, L)
    assert end_logits.shape == (B, L)
    print("KERNEL_OK")
</pallas_src>

<mosaic_0001>
module attributes {stable_mosaic.version = 11 : i64} {
  func.func @reader_kernel(%arg0: memref<16x32xf32, #tpu.memory_space<vmem>>, %arg1: memref<16x1xf32, #tpu.memory_space<vmem>>, %arg2: memref<1x16xf32, #tpu.memory_space<vmem>>, %arg3: memref<2x32x96xf32, #tpu.memory_space<vmem>>, %arg4: memref<2x1x96xf32, #tpu.memory_space<vmem>>, %arg5: memref<2x32x32xf32, #tpu.memory_space<vmem>>, %arg6: memref<2x1x32xf32, #tpu.memory_space<vmem>>, %arg7: memref<2x1x32xf32, #tpu.memory_space<vmem>>, %arg8: memref<2x1x32xf32, #tpu.memory_space<vmem>>, %arg9: memref<2x32x64xf32, #tpu.memory_space<vmem>>, %arg10: memref<2x1x64xf32, #tpu.memory_space<vmem>>, %arg11: memref<2x64x32xf32, #tpu.memory_space<vmem>>, %arg12: memref<2x1x32xf32, #tpu.memory_space<vmem>>, %arg13: memref<2x1x32xf32, #tpu.memory_space<vmem>>, %arg14: memref<2x1x32xf32, #tpu.memory_space<vmem>>, %arg15: memref<32x3xf32, #tpu.memory_space<vmem>>, %arg16: memref<1x3xf32, #tpu.memory_space<vmem>>, %arg17: memref<16x3xf32, #tpu.memory_space<vmem>>) attributes {dimension_semantics = [], scalar_prefetch = 0 : i64, scratch_operands = 0 : i64, tpu.core_type = #tpu.core_type<tc>} {
    %c0 = arith.constant 0 : index
    %c0_0 = arith.constant 0 : index
    %0 = vector.load %arg0[%c0, %c0_0] : memref<16x32xf32, #tpu.memory_space<vmem>>, vector<16x32xf32>
    %c0_1 = arith.constant 0 : index
    %c0_2 = arith.constant 0 : index
    %1 = vector.load %arg1[%c0_1, %c0_2] : memref<16x1xf32, #tpu.memory_space<vmem>>, vector<16x1xf32>
    %c0_3 = arith.constant 0 : index
    %c0_4 = arith.constant 0 : index
    %2 = vector.load %arg2[%c0_3, %c0_4] : memref<1x16xf32, #tpu.memory_space<vmem>>, vector<1x16xf32>
    %3 = vector.broadcast %1 : vector<16x1xf32> to vector<16x16xf32>
    %4 = vector.broadcast %2 : vector<1x16xf32> to vector<16x16xf32>
    %5 = arith.cmpf oeq, %3, %4 : vector<16x16xf32>
    %cst = arith.constant 0.000000e+00 : f32
    %cst_5 = arith.constant -1.000000e+09 : f32
    %6 = vector.broadcast %cst : f32 to vector<16x16xf32>
    %7 = vector.broadcast %cst_5 : f32 to vector<16x16xf32>
    %8 = arith.select %5, %6, %7 : vector<16x16xi1>, vector<16x16xf32>
    %c0_6 = arith.constant 0 : index
    %c0_7 = arith.constant 0 : index
    %c0_8 = arith.constant 0 : index
    %9 = vector.load %arg3[%c0_6, %c0_7, %c0_8] : memref<2x32x96xf32, #tpu.memory_space<vmem>>, vector<1x32x96xf32>
    %10 = vector.shape_cast %9 : vector<1x32x96xf32> to vector<32x96xf32>
    %cst_9 = arith.constant dense<0.000000e+00> : vector<16x96xf32>
    %11 = tpu.matmul %0, %10, %cst_9 {dimension_numbers = #tpu.dot_dimension_numbers<[1], [0], [0], [1], [0, 0, 1, 1], [], []>} : vector<16x32xf32>, vector<32x96xf32>, vector<16x96xf32> -> vector<16x96xf32>
    %c0_10 = arith.constant 0 : index
    %c0_11 = arith.constant 0 : index
    %c0_12 = arith.constant 0 : index
    %12 = vector.load %arg4[%c0_10, %c0_11, %c0_12] : memref<2x1x96xf32, #tpu.memory_space<vmem>>, vector<1x1x96xf32>
    %13 = vector.shape_cast %12 : vector<1x1x96xf32> to vector<1x96xf32>
    %14 = vector.broadcast %13 : vector<1x96xf32> to vector<16x96xf32>
    %15 = arith.addf %11, %14 : vector<16x96xf32>
    %16 = vector.extract_strided_slice %15 {offsets = [0, 0], sizes = [16, 32], strides = [1, 1]} : vector<16x96xf32> to vector<16x32xf32>
    %17 = vector.extract_strided_slice %15 {offsets = [0, 32], sizes = [16, 32], strides = [1, 1]} : vector<16x96xf32> to vector<16x32xf32>
    %18 = vector.extract_strided_slice %15 {offsets = [0, 64], sizes = [16, 32], strides = [1, 1]} : vector<16x96xf32> to vector<16x32xf32>
    %19 = vector.extract_strided_slice %16 {offsets = [0, 0], sizes = [16, 8], strides = [1, 1]} : vector<16x32xf32> to vector<16x8xf32>
    %20 = vector.extract_strided_slice %17 {offsets = [0, 0], sizes = [16, 8], strides = [1, 1]} : vector<16x32xf32> to vector<16x8xf32>
    %cst_13 = arith.constant dense<0.000000e+00> : vector<16x16xf32>
    %21 = tpu.matmul %19, %20, %cst_13 {dimension_numbers = #tpu.dot_dimension_numbers<[1], [1], [0], [0], [0, 0, 1, 0], [], []>} : vector<16x8xf32>, vector<16x8xf32>, vector<16x16xf32> -> vector<16x16xf32>
    %cst_14 = arith.constant 0.353553385 : f32
    %22 = vector.broadcast %cst_14 : f32 to vector<16x16xf32>
    %23 = arith.mulf %21, %22 : vector<16x16xf32>
    %24 = arith.addf %23, %8 : vector<16x16xf32>
    %cst_15 = arith.constant dense<0xFF800000> : vector<16xf32>
    %25 = vector.multi_reduction <maximumf>, %24, %cst_15 [1] : vector<16x16xf32> to vector<16xf32>
    %26 = vector.shape_cast %25 : vector<16xf32> to vector<16x1xf32>
    %27 = vector.broadcast %26 : vector<16x1xf32> to vector<16x16xf32>
    %28 = arith.subf %24, %27 : vector<16x16xf32>
    %29 = math.exp %28 : vector<16x16xf32>
    %cst_16 = arith.constant dense<0.000000e+00> : vector<16xf32>
    %30 = vector.multi_reduction <add>, %29, %cst_16 [1] : vector<16x16xf32> to vector<16xf32>
    %31 = vector.shape_cast %30 : vector<16xf32> to vector<16x1xf32>
    %32 = tpu.reciprocal %31 {approx = true} : vector<16x1xf32> -> vector<16x1xf32>
    %33 = vector.broadcast %32 : vector<16x1xf32> to vector<16x16xf32>
    %34 = arith.mulf %29, %33 : vector<16x16xf32>
    %35 = vector.extract_strided_slice %18 {offsets = [0, 0], sizes = [16, 8], strides = [1, 1]} : vector<16x32xf32> to vector<16x8xf32>
    %cst_17 = arith.constant dense<0.000000e+00> : vector<16x8xf32>
    %36 = tpu.matmul %34, %35, %cst_17 {dimension_numbers = #tpu.dot_dimension_numbers<[1], [0], [0], [1], [0, 0, 1, 1], [], []>} : vector<16x16xf32>, vector<16x8xf32>, vector<16x8xf32> -> vector<16x8xf32>
    %37 = vector.extract_strided_slice %16 {offsets = [0, 8], sizes = [16, 8], strides = [1, 1]} : vector<16x32xf32> to vector<16x8xf32>
    %38 = vector.extract_strided_slice %17 {offsets = [0, 8], sizes = [16, 8], strides = [1, 1]} : vector<16x32xf32> to vector<16x8xf32>
    %cst_18 = arith.constant dense<0.000000e+00> : vector<16x16xf32>
    %39 = tpu.matmul %37, %38, %cst_18 {dimension_numbers = #tpu.dot_dimension_numbers<[1], [1], [0], [0], [0, 0, 1, 0], [], []>} : vector<16x8xf32>, vector<16x8xf32>, vector<16x16xf32> -> vector<16x16xf32>
    %cst_19 = arith.constant 0.353553385 : f32
    %40 = vector.broadcast %cst_19 : f32 to vector<16x16xf32>
    %41 = arith.mulf %39, %40 : vector<16x16xf32>
    %42 = arith.addf %41, %8 : vector<16x16xf32>
    %cst_20 = arith.constant dense<0xFF800000> : vector<16xf32>
    %43 = vector.multi_reduction <maximumf>, %42, %cst_20 [1] : vector<16x16xf32> to vector<16xf32>
    %44 = vector.shape_cast %43 : vector<16xf32> to vector<16x1xf32>
    %45 = vector.broadcast %44 : vector<16x1xf32> to vector<16x16xf32>
    %46 = arith.subf %42, %45 : vector<16x16xf32>
    %47 = math.exp %46 : vector<16x16xf32>
    %cst_21 = arith.constant dense<0.000000e+00> : vector<16xf32>
    %48 = vector.multi_reduction <add>, %47, %cst_21 [1] : vector<16x16xf32> to vector<16xf32>
    %49 = vector.shape_cast %48 : vector<16xf32> to vector<16x1xf32>
    %50 = tpu.reciprocal %49 {approx = true} : vector<16x1xf32> -> vector<16x1xf32>
    %51 = vector.broadcast %50 : vector<16x1xf32> to vector<16x16xf32>
    %52 = arith.mulf %47, %51 : vector<16x16xf32>
    %53 = vector.extract_strided_slice %18 {offsets = [0, 8], sizes = [16, 8], strides = [1, 1]} : vector<16x32xf32> to vector<16x8xf32>
    %cst_22 = arith.constant dense<0.000000e+00> : vector<16x8xf32>
    %54 = tpu.matmul %52, %53, %cst_22 {dimension_numbers = #tpu.dot_dimension_numbers<[1], [0], [0], [1], [0, 0, 1, 1], [], []>} : vector<16x16xf32>, vector<16x8xf32>, vector<16x8xf32> -> vector<16x8xf32>
    %55 = vector.extract_strided_slice %16 {offsets = [0, 16], sizes = [16, 8], strides = [1, 1]} : vector<16x32xf32> to vector<16x8xf32>
    %56 = vector.extract_strided_slice %17 {offsets = [0, 16], sizes = [16, 8], strides = [1, 1]} : vector<16x32xf32> to vector<16x8xf32>
    %cst_23 = arith.constant dense<0.000000e+00> : vector<16x16xf32>
    %57 = tpu.matmul %55, %56, %cst_23 {dimension_numbers = #tpu.dot_dimension_numbers<[1], [1], [0], [0], [0, 0, 1, 0], [], []>} : vector<16x8xf32>, vector<16x8xf32>, vector<16x16xf32> -> vector<16x16xf32>
    %cst_24 = arith.constant 0.353553385 : f32
    %58 = vector.broadcast %cst_24 : f32 to vector<16x16xf32>
    %59 = arith.mulf %57, %58 : vector<16x16xf32>
    %60 = arith.addf %59, %8 : vector<16x16xf32>
    %cst_25 = arith.constant dense<0xFF800000> : vector<16xf32>
    %61 = vector.multi_reduction <maximumf>, %60, %cst_25 [1] : vector<16x16xf32> to vector<16xf32>
    %62 = vector.shape_cast %61 : vector<16xf32> to vector<16x1xf32>
    %63 = vector.broadcast %62 : vector<16x1xf32> to vector<16x16xf32>
    %64 = arith.subf %60, %63 : vector<16x16xf32>
    %65 = math.exp %64 : vector<16x16xf32>
    %cst_26 = arith.constant dense<0.000000e+00> : vector<16xf32>
    %66 = vector.multi_reduction <add>, %65, %cst_26 [1] : vector<16x16xf32> to vector<16xf32>
    %67 = vector.shape_cast %66 : vector<16xf32> to vector<16x1xf32>
    %68 = tpu.reciprocal %67 {approx = true} : vector<16x1xf32> -> vector<16x1xf32>
    %69 = vector.broadcast %68 : vector<16x1xf32> to vector<16x16xf32>
    %70 = arith.mulf %65, %69 : vector<16x16xf32>
    %71 = vector.extract_strided_slice %18 {offsets = [0, 16], sizes = [16, 8], strides = [1, 1]} : vector<16x32xf32> to vector<16x8xf32>
    %cst_27 = arith.constant dense<0.000000e+00> : vector<16x8xf32>
    %72 = tpu.matmul %70, %71, %cst_27 {dimension_numbers = #tpu.dot_dimension_numbers<[1], [0], [0], [1], [0, 0, 1, 1], [], []>} : vector<16x16xf32>, vector<16x8xf32>, vector<16x8xf32> -> vector<16x8xf32>
    %73 = vector.extract_strided_slice %16 {offsets = [0, 24], sizes = [16, 8], strides = [1, 1]} : vector<16x32xf32> to vector<16x8xf32>
    %74 = vector.extract_strided_slice %17 {offsets = [0, 24], sizes = [16, 8], strides = [1, 1]} : vector<16x32xf32> to vector<16x8xf32>
    %cst_28 = arith.constant dense<0.000000e+00> : vector<16x16xf32>
    %75 = tpu.matmul %73, %74, %cst_28 {dimension_numbers = #tpu.dot_dimension_numbers<[1], [1], [0], [0], [0, 0, 1, 0], [], []>} : vector<16x8xf32>, vector<16x8xf32>, vector<16x16xf32> -> vector<16x16xf32>
    %cst_29 = arith.constant 0.353553385 : f32
    %76 = vector.broadcast %cst_29 : f32 to vector<16x16xf32>
    %77 = arith.mulf %75, %76 : vector<16x16xf32>
    %78 = arith.addf %77, %8 : vector<16x16xf32>
    %cst_30 = arith.constant dense<0xFF800000> : vector<16xf32>
    %79 = vector.multi_reduction <maximumf>, %78, %cst_30 [1] : vector<16x16xf32> to vector<16xf32>
    %80 = vector.shape_cast %79 : vector<16xf32> to vector<16x1xf32>
    %81 = vector.broadcast %80 : vector<16x1xf32> to vector<16x16xf32>
    %82 = arith.subf %78, %81 : vector<16x16xf32>
    %83 = math.exp %82 : vector<16x16xf32>
    %cst_31 = arith.constant dense<0.000000e+00> : vector<16xf32>
    %84 = vector.multi_reduction <add>, %83, %cst_31 [1] : vector<16x16xf32> to vector<16xf32>
    %85 = vector.shape_cast %84 : vector<16xf32> to vector<16x1xf32>
    %86 = tpu.reciprocal %85 {approx = true} : vector<16x1xf32> -> vector<16x1xf32>
    %87 = vector.broadcast %86 : vector<16x1xf32> to vector<16x16xf32>
    %88 = arith.mulf %83, %87 : vector<16x16xf32>
    %89 = vector.extract_strided_slice %18 {offsets = [0, 24], sizes = [16, 8], strides = [1, 1]} : vector<16x32xf32> to vector<16x8xf32>
    %cst_32 = arith.constant dense<0.000000e+00> : vector<16x8xf32>
    %90 = tpu.matmul %88, %89, %cst_32 {dimension_numbers = #tpu.dot_dimension_numbers<[1], [0], [0], [1], [0, 0, 1, 1], [], []>} : vector<16x16xf32>, vector<16x8xf32>, vector<16x8xf32> -> vector<16x8xf32>
    %91 = tpu.concatenate %36, %54, %72, %90 in 1 : vector<16x8xf32>, vector<16x8xf32>, vector<16x8xf32>, vector<16x8xf32> -> vector<16x32xf32>
    %c0_33 = arith.constant 0 : index
    %c0_34 = arith.constant 0 : index
    %c0_35 = arith.constant 0 : index
    %92 = vector.load %arg5[%c0_33, %c0_34, %c0_35] : memref<2x32x32xf32, #tpu.memory_space<vmem>>, vector<1x32x32xf32>
    %93 = vector.shape_cast %92 : vector<1x32x32xf32> to vector<32x32xf32>
    %cst_36 = arith.constant dense<0.000000e+00> : vector<16x32xf32>
    %94 = tpu.matmul %91, %93, %cst_36 {dimension_numbers = #tpu.dot_dimension_numbers<[1], [0], [0], [1], [0, 0, 1, 1], [], []>} : vector<16x32xf32>, vector<32x32xf32>, vector<16x32xf32> -> vector<16x32xf32>
    %c0_37 = arith.constant 0 : index
    %c0_38 = arith.constant 0 : index
    %c0_39 = arith.constant 0 : index
    %95 = vector.load %arg6[%c0_37, %c0_38, %c0_39] : memref<2x1x32xf32, #tpu.memory_space<vmem>>, vector<1x1x32xf32>
    %96 = vector.shape_cast %95 : vector<1x1x32xf32> to vector<1x32xf32>
    %97 = vector.broadcast %96 : vector<1x32xf32> to vector<16x32xf32>
    %98 = arith.addf %94, %97 : vector<16x32xf32>
    %99 = arith.addf %0, %98 : vector<16x32xf32>
    %c0_40 = arith.constant 0 : index
    %c0_41 = arith.constant 0 : index
    %c0_42 = arith.constant 0 : index
    %100 = vector.load %arg7[%c0_40, %c0_41, %c0_42] : memref<2x1x32xf32, #tpu.memory_space<vmem>>, vector<1x1x32xf32>
    %101 = vector.shape_cast %100 : vector<1x1x32xf32> to vector<1x32xf32>
    %c0_43 = arith.constant 0 : index
    %c0_44 = arith.constant 0 : index
    %c0_45 = arith.constant 0 : index
    %102 = vector.load %arg8[%c0_43, %c0_44, %c0_45] : memref<2x1x32xf32, #tpu.memory_space<vmem>>, vector<1x1x32xf32>
    %103 = vector.shape_cast %102 : vector<1x1x32xf32> to vector<1x32xf32>
    %cst_46 = arith.constant dense<0.000000e+00> : vector<16xf32>
    %104 = vector.multi_reduction <add>, %99, %cst_46 [1] : vector<16x32xf32> to vector<16xf32>
    %105 = vector.shape_cast %104 : vector<16xf32> to vector<16x1xf32>
    %cst_47 = arith.constant 3.200000e+01 : f32
    %106 = vector.broadcast %cst_47 : f32 to vector<16x1xf32>
    %107 = arith.divf %105, %106 : vector<16x1xf32>
    %108 = vector.broadcast %107 : vector<16x1xf32> to vector<16x32xf32>
    %109 = arith.subf %99, %108 : vector<16x32xf32>
    %110 = arith.mulf %109, %109 : vector<16x32xf32>
    %cst_48 = arith.constant dense<0.000000e+00> : vector<16xf32>
    %111 = vector.multi_reduction <add>, %110, %cst_48 [1] : vector<16x32xf32> to vector<16xf32>
    %112 = vector.shape_cast %111 : vector<16xf32> to vector<16x1xf32>
    %cst_49 = arith.constant 3.200000e+01 : f32
    %113 = vector.broadcast %cst_49 : f32 to vector<16x1xf32>
    %114 = arith.divf %112, %113 : vector<16x1xf32>
    %115 = vector.broadcast %107 : vector<16x1xf32> to vector<16x32xf32>
    %116 = arith.subf %99, %115 : vector<16x32xf32>
    %cst_50 = arith.constant 9.99999996E-13 : f32
    %117 = vector.broadcast %cst_50 : f32 to vector<16x1xf32>
    %118 = arith.addf %114, %117 : vector<16x1xf32>
    %119 = math.rsqrt %118 : vector<16x1xf32>
    %120 = vector.broadcast %119 : vector<16x1xf32> to vector<16x32xf32>
    %121 = arith.mulf %116, %120 : vector<16x32xf32>
    %122 = vector.broadcast %101 : vector<1x32xf32> to vector<16x32xf32>
    %123 = arith.mulf %121, %122 : vector<16x32xf32>
    %124 = vector.broadcast %103 : vector<1x32xf32> to vector<16x32xf32>
    %125 = arith.addf %123, %124 : vector<16x32xf32>
    %c0_51 = arith.constant 0 : index
    %c0_52 = arith.constant 0 : index
    %c0_53 = arith.constant 0 : index
    %126 = vector.load %arg9[%c0_51, %c0_52, %c0_53] : memref<2x32x64xf32, #tpu.memory_space<vmem>>, vector<1x32x64xf32>
    %127 = vector.shape_cast %126 : vector<1x32x64xf32> to vector<32x64xf32>
    %cst_54 = arith.constant dense<0.000000e+00> : vector<16x64xf32>
    %128 = tpu.matmul %125, %127, %cst_54 {dimension_numbers = #tpu.dot_dimension_numbers<[1], [0], [0], [1], [0, 0, 1, 1], [], []>} : vector<16x32xf32>, vector<32x64xf32>, vector<16x64xf32> -> vector<16x64xf32>
    %c0_55 = arith.constant 0 : index
    %c0_56 = arith.constant 0 : index
    %c0_57 = arith.constant 0 : index
    %129 = vector.load %arg10[%c0_55, %c0_56, %c0_57] : memref<2x1x64xf32, #tpu.memory_space<vmem>>, vector<1x1x64xf32>
    %130 = vector.shape_cast %129 : vector<1x1x64xf32> to vector<1x64xf32>
    %131 = vector.broadcast %130 : vector<1x64xf32> to vector<16x64xf32>
    %132 = arith.addf %128, %131 : vector<16x64xf32>
    %133 = arith.mulf %132, %132 : vector<16x64xf32>
    %134 = arith.mulf %132, %133 : vector<16x64xf32>
    %cst_58 = arith.constant 4.471500e-02 : f32
    %135 = vector.broadcast %cst_58 : f32 to vector<16x64xf32>
    %136 = arith.mulf %135, %134 : vector<16x64xf32>
    %137 = arith.addf %132, %136 : vector<16x64xf32>
    %cst_59 = arith.constant 0.797884583 : f32
    %138 = vector.broadcast %cst_59 : f32 to vector<16x64xf32>
    %139 = arith.mulf %138, %137 : vector<16x64xf32>
    %140 = math.tanh %139 : vector<16x64xf32>
    %cst_60 = arith.constant 1.000000e+00 : f32
    %141 = vector.broadcast %cst_60 : f32 to vector<16x64xf32>
    %142 = arith.addf %141, %140 : vector<16x64xf32>
    %cst_61 = arith.constant 5.000000e-01 : f32
    %143 = vector.broadcast %cst_61 : f32 to vector<16x64xf32>
    %144 = arith.mulf %143, %142 : vector<16x64xf32>
    %145 = arith.mulf %132, %144 : vector<16x64xf32>
    %c0_62 = arith.constant 0 : index
    %c0_63 = arith.constant 0 : index
    %c0_64 = arith.constant 0 : index
    %146 = vector.load %arg11[%c0_62, %c0_63, %c0_64] : memref<2x64x32xf32, #tpu.memory_space<vmem>>, vector<1x64x32xf32>
    %147 = vector.shape_cast %146 : vector<1x64x32xf32> to vector<64x32xf32>
    %cst_65 = arith.constant dense<0.000000e+00> : vector<16x32xf32>
    %148 = tpu.matmul %145, %147, %cst_65 {dimension_numbers = #tpu.dot_dimension_numbers<[1], [0], [0], [1], [0, 0, 1, 1], [], []>} : vector<16x64xf32>, vector<64x32xf32>, vector<16x32xf32> -> vector<16x32xf32>
    %c0_66 = arith.constant 0 : index
    %c0_67 = arith.constant 0 : index
    %c0_68 = arith.constant 0 : index
    %149 = vector.load %arg12[%c0_66, %c0_67, %c0_68] : memref<2x1x32xf32, #tpu.memory_space<vmem>>, vector<1x1x32xf32>
    %150 = vector.shape_cast %149 : vector<1x1x32xf32> to vector<1x32xf32>
    %151 = vector.broadcast %150 : vector<1x32xf32> to vector<16x32xf32>
    %152 = arith.addf %148, %151 : vector<16x32xf32>
    %153 = arith.addf %125, %152 : vector<16x32xf32>
    %c0_69 = arith.constant 0 : index
    %c0_70 = arith.constant 0 : index
    %c0_71 = arith.constant 0 : index
    %154 = vector.load %arg13[%c0_69, %c0_70, %c0_71] : memref<2x1x32xf32, #tpu.memory_space<vmem>>, vector<1x1x32xf32>
    %155 = vector.shape_cast %154 : vector<1x1x32xf32> to vector<1x32xf32>
    %c0_72 = arith.constant 0 : index
    %c0_73 = arith.constant 0 : index
    %c0_74 = arith.constant 0 : index
    %156 = vector.load %arg14[%c0_72, %c0_73, %c0_74] : memref<2x1x32xf32, #tpu.memory_space<vmem>>, vector<1x1x32xf32>
    %157 = vector.shape_cast %156 : vector<1x1x32xf32> to vector<1x32xf32>
    %cst_75 = arith.constant dense<0.000000e+00> : vector<16xf32>
    %158 = vector.multi_reduction <add>, %153, %cst_75 [1] : vector<16x32xf32> to vector<16xf32>
    %159 = vector.shape_cast %158 : vector<16xf32> to vector<16x1xf32>
    %cst_76 = arith.constant 3.200000e+01 : f32
    %160 = vector.broadcast %cst_76 : f32 to vector<16x1xf32>
    %161 = arith.divf %159, %160 : vector<16x1xf32>
    %162 = vector.broadcast %161 : vector<16x1xf32> to vector<16x32xf32>
    %163 = arith.subf %153, %162 : vector<16x32xf32>
    %164 = arith.mulf %163, %163 : vector<16x32xf32>
    %cst_77 = arith.constant dense<0.000000e+00> : vector<16xf32>
    %165 = vector.multi_reduction <add>, %164, %cst_77 [1] : vector<16x32xf32> to vector<16xf32>
    %166 = vector.shape_cast %165 : vector<16xf32> to vector<16x1xf32>
    %cst_78 = arith.constant 3.200000e+01 : f32
    %167 = vector.broadcast %cst_78 : f32 to vector<16x1xf32>
    %168 = arith.divf %166, %167 : vector<16x1xf32>
    %169 = vector.broadcast %161 : vector<16x1xf32> to vector<16x32xf32>
    %170 = arith.subf %153, %169 : vector<16x32xf32>
    %cst_79 = arith.constant 9.99999996E-13 : f32
    %171 = vector.broadcast %cst_79 : f32 to vector<16x1xf32>
    %172 = arith.addf %168, %171 : vector<16x1xf32>
    %173 = math.rsqrt %172 : vector<16x1xf32>
    %174 = vector.broadcast %173 : vector<16x1xf32> to vector<16x32xf32>
    %175 = arith.mulf %170, %174 : vector<16x32xf32>
    %176 = vector.broadcast %155 : vector<1x32xf32> to vector<16x32xf32>
    %177 = arith.mulf %175, %176 : vector<16x32xf32>
    %178 = vector.broadcast %157 : vector<1x32xf32> to vector<16x32xf32>
    %179 = arith.addf %177, %178 : vector<16x32xf32>
    %c1 = arith.constant 1 : index
    %c0_80 = arith.constant 0 : index
    %c0_81 = arith.constant 0 : index
    %180 = vector.load %arg3[%c1, %c0_80, %c0_81] : memref<2x32x96xf32, #tpu.memory_space<vmem>>, vector<1x32x96xf32>
    %181 = vector.shape_cast %180 : vector<1x32x96xf32> to vector<32x96xf32>
    %cst_82 = arith.constant dense<0.000000e+00> : vector<16x96xf32>
    %182 = tpu.matmul %179, %181, %cst_82 {dimension_numbers = #tpu.dot_dimension_numbers<[1], [0], [0], [1], [0, 0, 1, 1], [], []>} : vector<16x32xf32>, vector<32x96xf32>, vector<16x96xf32> -> vector<16x96xf32>
    %c1_83 = arith.constant 1 : index
    %c0_84 = arith.constant 0 : index
    %c0_85 = arith.constant 0 : index
    %183 = vector.load %arg4[%c1_83, %c0_84, %c0_85] : memref<2x1x96xf32, #tpu.memory_space<vmem>>, vector<1x1x96xf32>
    %184 = vector.shape_cast %183 : vector<1x1x96xf32> to vector<1x96xf32>
    %185 = vector.broadcast %184 : vector<1x96xf32> to vector<16x96xf32>
    %186 = arith.addf %182, %185 : vector<16x96xf32>
    %187 = vector.extract_strided_slice %186 {offsets = [0, 0], sizes = [16, 32], strides = [1, 1]} : vector<16x96xf32> to vector<16x32xf32>
    %188 = vector.extract_strided_slice %186 {offsets = [0, 32], sizes = [16, 32], strides = [1, 1]} : vector<16x96xf32> to vector<16x32xf32>
    %189 = vector.extract_strided_slice %186 {offsets = [0, 64], sizes = [16, 32], strides = [1, 1]} : vector<16x96xf32> to vector<16x32xf32>
    %190 = vector.extract_strided_slice %187 {offsets = [0, 0], sizes = [16, 8], strides = [1, 1]} : vector<16x32xf32> to vector<16x8xf32>
    %191 = vector.extract_strided_slice %188 {offsets = [0, 0], sizes = [16, 8], strides = [1, 1]} : vector<16x32xf32> to vector<16x8xf32>
    %cst_86 = arith.constant dense<0.000000e+00> : vector<16x16xf32>
    %192 = tpu.matmul %190, %191, %cst_86 {dimension_numbers = #tpu.dot_dimension_numbers<[1], [1], [0], [0], [0, 0, 1, 0], [], []>} : vector<16x8xf32>, vector<16x8xf32>, vector<16x16xf32> -> vector<16x16xf32>
    %cst_87 = arith.constant 0.353553385 : f32
    %193 = vector.broadcast %cst_87 : f32 to vector<16x16xf32>
    %194 = arith.mulf %192, %193 : vector<16x16xf32>
    %195 = arith.addf %194, %8 : vector<16x16xf32>
    %cst_88 = arith.constant dense<0xFF800000> : vector<16xf32>
    %196 = vector.multi_reduction <maximumf>, %195, %cst_88 [1] : vector<16x16xf32> to vector<16xf32>
    %197 = vector.shape_cast %196 : vector<16xf32> to vector<16x1xf32>
    %198 = vector.broadcast %197 : vector<16x1xf32> to vector<16x16xf32>
    %199 = arith.subf %195, %198 : vector<16x16xf32>
    %200 = math.exp %199 : vector<16x16xf32>
    %cst_89 = arith.constant dense<0.000000e+00> : vector<16xf32>
    %201 = vector.multi_reduction <add>, %200, %cst_89 [1] : vector<16x16xf32> to vector<16xf32>
    %202 = vector.shape_cast %201 : vector<16xf32> to vector<16x1xf32>
    %203 = tpu.reciprocal %202 {approx = true} : vector<16x1xf32> -> vector<16x1xf32>
    %204 = vector.broadcast %203 : vector<16x1xf32> to vector<16x16xf32>
    %205 = arith.mulf %200, %204 : vector<16x16xf32>
    %206 = vector.extract_strided_slice %189 {offsets = [0, 0], sizes = [16, 8], strides = [1, 1]} : vector<16x32xf32> to vector<16x8xf32>
    %cst_90 = arith.constant dense<0.000000e+00> : vector<16x8xf32>
    %207 = tpu.matmul %205, %206, %cst_90 {dimension_numbers = #tpu.dot_dimension_numbers<[1], [0], [0], [1], [0, 0, 1, 1], [], []>} : vector<16x16xf32>, vector<16x8xf32>, vector<16x8xf32> -> vector<16x8xf32>
    %208 = vector.extract_strided_slice %187 {offsets = [0, 8], sizes = [16, 8], strides = [1, 1]} : vector<16x32xf32> to vector<16x8xf32>
    %209 = vector.extract_strided_slice %188 {offsets = [0, 8], sizes = [16, 8], strides = [1, 1]} : vector<16x32xf32> to vector<16x8xf32>
    %cst_91 = arith.constant dense<0.000000e+00> : vector<16x16xf32>
    %210 = tpu.matmul %208, %209, %cst_91 {dimension_numbers = #tpu.dot_dimension_numbers<[1], [1], [0], [0], [0, 0, 1, 0], [], []>} : vector<16x8xf32>, vector<16x8xf32>, vector<16x16xf32> -> vector<16x16xf32>
    %cst_92 = arith.constant 0.353553385 : f32
    %211 = vector.broadcast %cst_92 : f32 to vector<16x16xf32>
    %212 = arith.mulf %210, %211 : vector<16x16xf32>
    %213 = arith.addf %212, %8 : vector<16x16xf32>
    %cst_93 = arith.constant dense<0xFF800000> : vector<16xf32>
    %214 = vector.multi_reduction <maximumf>, %213, %cst_93 [1] : vector<16x16xf32> to vector<16xf32>
    %215 = vector.shape_cast %214 : vector<16xf32> to vector<16x1xf32>
    %216 = vector.broadcast %215 : vector<16x1xf32> to vector<16x16xf32>
    %217 = arith.subf %213, %216 : vector<16x16xf32>
    %218 = math.exp %217 : vector<16x16xf32>
    %cst_94 = arith.constant dense<0.000000e+00> : vector<16xf32>
    %219 = vector.multi_reduction <add>, %218, %cst_94 [1] : vector<16x16xf32> to vector<16xf32>
    %220 = vector.shape_cast %219 : vector<16xf32> to vector<16x1xf32>
    %221 = tpu.reciprocal %220 {approx = true} : vector<16x1xf32> -> vector<16x1xf32>
    %222 = vector.broadcast %221 : vector<16x1xf32> to vector<16x16xf32>
    %223 = arith.mulf %218, %222 : vector<16x16xf32>
    %224 = vector.extract_strided_slice %189 {offsets = [0, 8], sizes = [16, 8], strides = [1, 1]} : vector<16x32xf32> to vector<16x8xf32>
    %cst_95 = arith.constant dense<0.000000e+00> : vector<16x8xf32>
    %225 = tpu.matmul %223, %224, %cst_95 {dimension_numbers = #tpu.dot_dimension_numbers<[1], [0], [0], [1], [0, 0, 1, 1], [], []>} : vector<16x16xf32>, vector<16x8xf32>, vector<16x8xf32> -> vector<16x8xf32>
    %226 = vector.extract_strided_slice %187 {offsets = [0, 16], sizes = [16, 8], strides = [1, 1]} : vector<16x32xf32> to vector<16x8xf32>
    %227 = vector.extract_strided_slice %188 {offsets = [0, 16], sizes = [16, 8], strides = [1, 1]} : vector<16x32xf32> to vector<16x8xf32>
    %cst_96 = arith.constant dense<0.000000e+00> : vector<16x16xf32>
    %228 = tpu.matmul %226, %227, %cst_96 {dimension_numbers = #tpu.dot_dimension_numbers<[1], [1], [0], [0], [0, 0, 1, 0], [], []>} : vector<16x8xf32>, vector<16x8xf32>, vector<16x16xf32> -> vector<16x16xf32>
    %cst_97 = arith.constant 0.353553385 : f32
    %229 = vector.broadcast %cst_97 : f32 to vector<16x16xf32>
    %230 = arith.mulf %228, %229 : vector<16x16xf32>
    %231 = arith.addf %230, %8 : vector<16x16xf32>
    %cst_98 = arith.constant dense<0xFF800000> : vector<16xf32>
    %232 = vector.multi_reduction <maximumf>, %231, %cst_98 [1] : vector<16x16xf32> to vector<16xf32>
    %233 = vector.shape_cast %232 : vector<16xf32> to vector<16x1xf32>
    %234 = vector.broadcast %233 : vector<16x1xf32> to vector<16x16xf32>
    %235 = arith.subf %231, %234 : vector<16x16xf32>
    %236 = math.exp %235 : vector<16x16xf32>
    %cst_99 = arith.constant dense<0.000000e+00> : vector<16xf32>
    %237 = vector.multi_reduction <add>, %236, %cst_99 [1] : vector<16x16xf32> to vector<16xf32>
    %238 = vector.shape_cast %237 : vector<16xf32> to vector<16x1xf32>
    %239 = tpu.reciprocal %238 {approx = true} : vector<16x1xf32> -> vector<16x1xf32>
    %240 = vector.broadcast %239 : vector<16x1xf32> to vector<16x16xf32>
    %241 = arith.mulf %236, %240 : vector<16x16xf32>
    %242 = vector.extract_strided_slice %189 {offsets = [0, 16], sizes = [16, 8], strides = [1, 1]} : vector<16x32xf32> to vector<16x8xf32>
    %cst_100 = arith.constant dense<0.000000e+00> : vector<16x8xf32>
    %243 = tpu.matmul %241, %242, %cst_100 {dimension_numbers = #tpu.dot_dimension_numbers<[1], [0], [0], [1], [0, 0, 1, 1], [], []>} : vector<16x16xf32>, vector<16x8xf32>, vector<16x8xf32> -> vector<16x8xf32>
    %244 = vector.extract_strided_slice %187 {offsets = [0, 24], sizes = [16, 8], strides = [1, 1]} : vector<16x32xf32> to vector<16x8xf32>
    %245 = vector.extract_strided_slice %188 {offsets = [0, 24], sizes = [16, 8], strides = [1, 1]} : vector<16x32xf32> to vector<16x8xf32>
    %cst_101 = arith.constant dense<0.000000e+00> : vector<16x16xf32>
    %246 = tpu.matmul %244, %245, %cst_101 {dimension_numbers = #tpu.dot_dimension_numbers<[1], [1], [0], [0], [0, 0, 1, 0], [], []>} : vector<16x8xf32>, vector<16x8xf32>, vector<16x16xf32> -> vector<16x16xf32>
    %cst_102 = arith.constant 0.353553385 : f32
    %247 = vector.broadcast %cst_102 : f32 to vector<16x16xf32>
    %248 = arith.mulf %246, %247 : vector<16x16xf32>
    %249 = arith.addf %248, %8 : vector<16x16xf32>
    %cst_103 = arith.constant dense<0xFF800000> : vector<16xf32>
    %250 = vector.multi_reduction <maximumf>, %249, %cst_103 [1] : vector<16x16xf32> to vector<16xf32>
    %251 = vector.shape_cast %250 : vector<16xf32> to vector<16x1xf32>
    %252 = vector.broadcast %251 : vector<16x1xf32> to vector<16x16xf32>
    %253 = arith.subf %249, %252 : vector<16x16xf32>
    %254 = math.exp %253 : vector<16x16xf32>
    %cst_104 = arith.constant dense<0.000000e+00> : vector<16xf32>
    %255 = vector.multi_reduction <add>, %254, %cst_104 [1] : vector<16x16xf32> to vector<16xf32>
    %256 = vector.shape_cast %255 : vector<16xf32> to vector<16x1xf32>
    %257 = tpu.reciprocal %256 {approx = true} : vector<16x1xf32> -> vector<16x1xf32>
    %258 = vector.broadcast %257 : vector<16x1xf32> to vector<16x16xf32>
    %259 = arith.mulf %254, %258 : vector<16x16xf32>
    %260 = vector.extract_strided_slice %189 {offsets = [0, 24], sizes = [16, 8], strides = [1, 1]} : vector<16x32xf32> to vector<16x8xf32>
    %cst_105 = arith.constant dense<0.000000e+00> : vector<16x8xf32>
    %261 = tpu.matmul %259, %260, %cst_105 {dimension_numbers = #tpu.dot_dimension_numbers<[1], [0], [0], [1], [0, 0, 1, 1], [], []>} : vector<16x16xf32>, vector<16x8xf32>, vector<16x8xf32> -> vector<16x8xf32>
    %262 = tpu.concatenate %207, %225, %243, %261 in 1 : vector<16x8xf32>, vector<16x8xf32>, vector<16x8xf32>, vector<16x8xf32> -> vector<16x32xf32>
    %c1_106 = arith.constant 1 : index
    %c0_107 = arith.constant 0 : index
    %c0_108 = arith.constant 0 : index
    %263 = vector.load %arg5[%c1_106, %c0_107, %c0_108] : memref<2x32x32xf32, #tpu.memory_space<vmem>>, vector<1x32x32xf32>
    %264 = vector.shape_cast %263 : vector<1x32x32xf32> to vector<32x32xf32>
    %cst_109 = arith.constant dense<0.000000e+00> : vector<16x32xf32>
    %265 = tpu.matmul %262, %264, %cst_109 {dimension_numbers = #tpu.dot_dimension_numbers<[1], [0], [0], [1], [0, 0, 1, 1], [], []>} : vector<16x32xf32>, vector<32x32xf32>, vector<16x32xf32> -> vector<16x32xf32>
    %c1_110 = arith.constant 1 : index
    %c0_111 = arith.constant 0 : index
    %c0_112 = arith.constant 0 : index
    %266 = vector.load %arg6[%c1_110, %c0_111, %c0_112] : memref<2x1x32xf32, #tpu.memory_space<vmem>>, vector<1x1x32xf32>
    %267 = vector.shape_cast %266 : vector<1x1x32xf32> to vector<1x32xf32>
    %268 = vector.broadcast %267 : vector<1x32xf32> to vector<16x32xf32>
    %269 = arith.addf %265, %268 : vector<16x32xf32>
    %270 = arith.addf %179, %269 : vector<16x32xf32>
    %c1_113 = arith.constant 1 : index
    %c0_114 = arith.constant 0 : index
    %c0_115 = arith.constant 0 : index
    %271 = vector.load %arg7[%c1_113, %c0_114, %c0_115] : memref<2x1x32xf32, #tpu.memory_space<vmem>>, vector<1x1x32xf32>
    %272 = vector.shape_cast %271 : vector<1x1x32xf32> to vector<1x32xf32>
    %c1_116 = arith.constant 1 : index
    %c0_117 = arith.constant 0 : index
    %c0_118 = arith.constant 0 : index
    %273 = vector.load %arg8[%c1_116, %c0_117, %c0_118] : memref<2x1x32xf32, #tpu.memory_space<vmem>>, vector<1x1x32xf32>
    %274 = vector.shape_cast %273 : vector<1x1x32xf32> to vector<1x32xf32>
    %cst_119 = arith.constant dense<0.000000e+00> : vector<16xf32>
    %275 = vector.multi_reduction <add>, %270, %cst_119 [1] : vector<16x32xf32> to vector<16xf32>
    %276 = vector.shape_cast %275 : vector<16xf32> to vector<16x1xf32>
    %cst_120 = arith.constant 3.200000e+01 : f32
    %277 = vector.broadcast %cst_120 : f32 to vector<16x1xf32>
    %278 = arith.divf %276, %277 : vector<16x1xf32>
    %279 = vector.broadcast %278 : vector<16x1xf32> to vector<16x32xf32>
    %280 = arith.subf %270, %279 : vector<16x32xf32>
    %281 = arith.mulf %280, %280 : vector<16x32xf32>
    %cst_121 = arith.constant dense<0.000000e+00> : vector<16xf32>
    %282 = vector.multi_reduction <add>, %281, %cst_121 [1] : vector<16x32xf32> to vector<16xf32>
    %283 = vector.shape_cast %282 : vector<16xf32> to vector<16x1xf32>
    %cst_122 = arith.constant 3.200000e+01 : f32
    %284 = vector.broadcast %cst_122 : f32 to vector<16x1xf32>
    %285 = arith.divf %283, %284 : vector<16x1xf32>
    %286 = vector.broadcast %278 : vector<16x1xf32> to vector<16x32xf32>
    %287 = arith.subf %270, %286 : vector<16x32xf32>
    %cst_123 = arith.constant 9.99999996E-13 : f32
    %288 = vector.broadcast %cst_123 : f32 to vector<16x1xf32>
    %289 = arith.addf %285, %288 : vector<16x1xf32>
    %290 = math.rsqrt %289 : vector<16x1xf32>
    %291 = vector.broadcast %290 : vector<16x1xf32> to vector<16x32xf32>
    %292 = arith.mulf %287, %291 : vector<16x32xf32>
    %293 = vector.broadcast %272 : vector<1x32xf32> to vector<16x32xf32>
    %294 = arith.mulf %292, %293 : vector<16x32xf32>
    %295 = vector.broadcast %274 : vector<1x32xf32> to vector<16x32xf32>
    %296 = arith.addf %294, %295 : vector<16x32xf32>
    %c1_124 = arith.constant 1 : index
    %c0_125 = arith.constant 0 : index
    %c0_126 = arith.constant 0 : index
    %297 = vector.load %arg9[%c1_124, %c0_125, %c0_126] : memref<2x32x64xf32, #tpu.memory_space<vmem>>, vector<1x32x64xf32>
    %298 = vector.shape_cast %297 : vector<1x32x64xf32> to vector<32x64xf32>
    %cst_127 = arith.constant dense<0.000000e+00> : vector<16x64xf32>
    %299 = tpu.matmul %296, %298, %cst_127 {dimension_numbers = #tpu.dot_dimension_numbers<[1], [0], [0], [1], [0, 0, 1, 1], [], []>} : vector<16x32xf32>, vector<32x64xf32>, vector<16x64xf32> -> vector<16x64xf32>
    %c1_128 = arith.constant 1 : index
    %c0_129 = arith.constant 0 : index
    %c0_130 = arith.constant 0 : index
    %300 = vector.load %arg10[%c1_128, %c0_129, %c0_130] : memref<2x1x64xf32, #tpu.memory_space<vmem>>, vector<1x1x64xf32>
    %301 = vector.shape_cast %300 : vector<1x1x64xf32> to vector<1x64xf32>
    %302 = vector.broadcast %301 : vector<1x64xf32> to vector<16x64xf32>
    %303 = arith.addf %299, %302 : vector<16x64xf32>
    %304 = arith.mulf %303, %303 : vector<16x64xf32>
    %305 = arith.mulf %303, %304 : vector<16x64xf32>
    %cst_131 = arith.constant 4.471500e-02 : f32
    %306 = vector.broadcast %cst_131 : f32 to vector<16x64xf32>
    %307 = arith.mulf %306, %305 : vector<16x64xf32>
    %308 = arith.addf %303, %307 : vector<16x64xf32>
    %cst_132 = arith.constant 0.797884583 : f32
    %309 = vector.broadcast %cst_132 : f32 to vector<16x64xf32>
    %310 = arith.mulf %309, %308 : vector<16x64xf32>
    %311 = math.tanh %310 : vector<16x64xf32>
    %cst_133 = arith.constant 1.000000e+00 : f32
    %312 = vector.broadcast %cst_133 : f32 to vector<16x64xf32>
    %313 = arith.addf %312, %311 : vector<16x64xf32>
    %cst_134 = arith.constant 5.000000e-01 : f32
    %314 = vector.broadcast %cst_134 : f32 to vector<16x64xf32>
    %315 = arith.mulf %314, %313 : vector<16x64xf32>
    %316 = arith.mulf %303, %315 : vector<16x64xf32>
    %c1_135 = arith.constant 1 : index
    %c0_136 = arith.constant 0 : index
    %c0_137 = arith.constant 0 : index
    %317 = vector.load %arg11[%c1_135, %c0_136, %c0_137] : memref<2x64x32xf32, #tpu.memory_space<vmem>>, vector<1x64x32xf32>
    %318 = vector.shape_cast %317 : vector<1x64x32xf32> to vector<64x32xf32>
    %cst_138 = arith.constant dense<0.000000e+00> : vector<16x32xf32>
    %319 = tpu.matmul %316, %318, %cst_138 {dimension_numbers = #tpu.dot_dimension_numbers<[1], [0], [0], [1], [0, 0, 1, 1], [], []>} : vector<16x64xf32>, vector<64x32xf32>, vector<16x32xf32> -> vector<16x32xf32>
    %c1_139 = arith.constant 1 : index
    %c0_140 = arith.constant 0 : index
    %c0_141 = arith.constant 0 : index
    %320 = vector.load %arg12[%c1_139, %c0_140, %c0_141] : memref<2x1x32xf32, #tpu.memory_space<vmem>>, vector<1x1x32xf32>
    %321 = vector.shape_cast %320 : vector<1x1x32xf32> to vector<1x32xf32>
    %322 = vector.broadcast %321 : vector<1x32xf32> to vector<16x32xf32>
    %323 = arith.addf %319, %322 : vector<16x32xf32>
    %324 = arith.addf %296, %323 : vector<16x32xf32>
    %c1_142 = arith.constant 1 : index
    %c0_143 = arith.constant 0 : index
    %c0_144 = arith.constant 0 : index
    %325 = vector.load %arg13[%c1_142, %c0_143, %c0_144] : memref<2x1x32xf32, #tpu.memory_space<vmem>>, vector<1x1x32xf32>
    %326 = vector.shape_cast %325 : vector<1x1x32xf32> to vector<1x32xf32>
    %c1_145 = arith.constant 1 : index
    %c0_146 = arith.constant 0 : index
    %c0_147 = arith.constant 0 : index
    %327 = vector.load %arg14[%c1_145, %c0_146, %c0_147] : memref<2x1x32xf32, #tpu.memory_space<vmem>>, vector<1x1x32xf32>
    %328 = vector.shape_cast %327 : vector<1x1x32xf32> to vector<1x32xf32>
    %cst_148 = arith.constant dense<0.000000e+00> : vector<16xf32>
    %329 = vector.multi_reduction <add>, %324, %cst_148 [1] : vector<16x32xf32> to vector<16xf32>
    %330 = vector.shape_cast %329 : vector<16xf32> to vector<16x1xf32>
    %cst_149 = arith.constant 3.200000e+01 : f32
    %331 = vector.broadcast %cst_149 : f32 to vector<16x1xf32>
    %332 = arith.divf %330, %331 : vector<16x1xf32>
    %333 = vector.broadcast %332 : vector<16x1xf32> to vector<16x32xf32>
    %334 = arith.subf %324, %333 : vector<16x32xf32>
    %335 = arith.mulf %334, %334 : vector<16x32xf32>
    %cst_150 = arith.constant dense<0.000000e+00> : vector<16xf32>
    %336 = vector.multi_reduction <add>, %335, %cst_150 [1] : vector<16x32xf32> to vector<16xf32>
    %337 = vector.shape_cast %336 : vector<16xf32> to vector<16x1xf32>
    %cst_151 = arith.constant 3.200000e+01 : f32
    %338 = vector.broadcast %cst_151 : f32 to vector<16x1xf32>
    %339 = arith.divf %337, %338 : vector<16x1xf32>
    %340 = vector.broadcast %332 : vector<16x1xf32> to vector<16x32xf32>
    %341 = arith.subf %324, %340 : vector<16x32xf32>
    %cst_152 = arith.constant 9.99999996E-13 : f32
    %342 = vector.broadcast %cst_152 : f32 to vector<16x1xf32>
    %343 = arith.addf %339, %342 : vector<16x1xf32>
    %344 = math.rsqrt %343 : vector<16x1xf32>
    %345 = vector.broadcast %344 : vector<16x1xf32> to vector<16x32xf32>
    %346 = arith.mulf %341, %345 : vector<16x32xf32>
    %347 = vector.broadcast %326 : vector<1x32xf32> to vector<16x32xf32>
    %348 = arith.mulf %346, %347 : vector<16x32xf32>
    %349 = vector.broadcast %328 : vector<1x32xf32> to vector<16x32xf32>
    %350 = arith.addf %348, %349 : vector<16x32xf32>
    %c0_153 = arith.constant 0 : index
    %c0_154 = arith.constant 0 : index
    %351 = vector.load %arg15[%c0_153, %c0_154] : memref<32x3xf32, #tpu.memory_space<vmem>>, vector<32x3xf32>
    %cst_155 = arith.constant dense<0.000000e+00> : vector<16x3xf32>
    %352 = tpu.matmul %350, %351, %cst_155 {dimension_numbers = #tpu.dot_dimension_numbers<[1], [0], [0], [1], [0, 0, 1, 1], [], []>} : vector<16x32xf32>, vector<32x3xf32>, vector<16x3xf32> -> vector<16x3xf32>
    %c0_156 = arith.constant 0 : index
    %c0_157 = arith.constant 0 : index
    %353 = vector.load %arg16[%c0_156, %c0_157] : memref<1x3xf32, #tpu.memory_space<vmem>>, vector<1x3xf32>
    %354 = vector.broadcast %353 : vector<1x3xf32> to vector<16x3xf32>
    %355 = arith.addf %352, %354 : vector<16x3xf32>
    %c0_158 = arith.constant 0 : index
    %c0_159 = arith.constant 0 : index
    %356 = vector.load %arg17[%c0_158, %c0_159] : memref<16x3xf32, #tpu.memory_space<vmem>>, vector<16x3xf32>
    tpu.vector_store %arg17[%c0_158, %c0_159], %355 {strides = array<i32>} : memref<16x3xf32, #tpu.memory_space<vmem>>, vector<16x3xf32>,
    return
  }
}

</mosaic_0001>

<bundles_post_ra>
// kernel: forward.1
= control target key start
LH: loop header
LB: loop body
LE: loop exit
PB: predicated region body
PF: predicated region fallthrough
CT: control target
= control target key end

     0   :  { %vm86_vm0 = vcmask 261120   ;;  %s1837_s25 = smov 88   ;;  %s1838_s27 = smov 96   ;;  %vm122_vm1 = vcmask 64512   ;;  %v1845_v15 = vmov 0   ;;  %vm158_vm3 = vcmask 130048   ;;  %s2457_s3 = inlined_call_operand.vmem [shape: f32[2,32,96], index: 3, kind: input, shape index: {}]   ;;  %s2458_s4 = inlined_call_operand.vmem [shape: f32[2,1,96], index: 4, kind: input, shape index: {}]   ;;  %s2459_s0 = inlined_call_operand.vmem [shape: f32[16,32], index: 0, kind: input, shape index: {}]   ;;  %s2460_s2 = inlined_call_operand.vmem [shape: f32[1,16], index: 2, kind: input, shape index: {}]   ;;  %s2461_s1 = inlined_call_operand.vmem [shape: f32[16,1], index: 1, kind: input, shape index: {}]   ;;  %s2462_s5 = inlined_call_operand.vmem [shape: f32[2,32,32], index: 5, kind: input, shape index: {}]   ;;  %s2463_s6 = inlined_call_operand.vmem [shape: f32[2,1,32], index: 6, kind: input, shape index: {}]   ;;  %s2464_s7 = inlined_call_operand.vmem [shape: f32[2,1,32], index: 7, kind: input, shape index: {}]   ;;  %s2465_s8 = inlined_call_operand.vmem [shape: f32[2,1,32], index: 8, kind: input, shape index: {}]   ;;  %s2466_s10 = inlined_call_operand.vmem [shape: f32[2,1,64], index: 10, kind: input, shape index: {}]   ;;  %s2467_s9 = inlined_call_operand.vmem [shape: f32[2,32,64], index: 9, kind: input, shape index: {}]   ;;  %s2468_s12 = inlined_call_operand.vmem [shape: f32[2,1,32], index: 12, kind: input, shape index: {}]   ;;  %s2469_s11 = inlined_call_operand.vmem [shape: f32[2,64,32], index: 11, kind: input, shape index: {}]   ;;  %s2470_s13 = inlined_call_operand.vmem [shape: f32[2,1,32], index: 13, kind: input, shape index: {}]   ;;  %s2471_s14 = inlined_call_operand.vmem [shape: f32[2,1,32], index: 14, kind: input, shape index: {}]   ;;  %s2472_s16 = inlined_call_operand.vmem [shape: f32[1,3], index: 16, kind: input, shape index: {}]   ;;  %s2473_s15 = inlined_call_operand.vmem [shape: f32[32,3], index: 15, kind: input, shape index: {}]   ;;  %s2474_s17 = inlined_call_operand.vmem [shape: f32[16,3], index: 17, kind: output, shape index: {}]  }
   0x1   :  { %2489 = sst [smem:[#allocation2_spill]] %s2457_s3  ;;  %v1959_v4 = vld [vmem:[%s2459_s0] sm:$0xff]  ;;  %v1966_v5 = vld [vmem:[%s2459_s0 + $0x8] sm:$0xff]  ;;  %s1839_s0 = smov 120   ;;  %1687 = vset.pattern.permute.xlu1 %v1845_v15  ;;  %1728 = vset.pattern.permute.xlu0 %v1845_v15  ;;  %v1846_v30 = vmov -1e+09  }
   0x2   :  { %2490 = sst [smem:[#allocation3_spill]] %s2458_s4  ;;  %s1840_s28 = smov 72   ;;  %v58_v14 = vld [vmem:[%s2461_s1] sm:$0xff]  ;;  %v59_v36 = vld [vmem:[%s2461_s1 + $0x8] sm:$0xff]  ;;  %vm544_vm5 = vcmask 195584   ;;  %vm716_vm13 = vcmask 523264  }
   0x3   :  { %s2491_s26 = sld [smem:[#allocation2_spill]]  ;;  %s2479_s29 = smov 64   ;;  %63 = vperm.xlu1 %1687, %v58_v14   ;;  %v1730_v28 = vld [vmem:[%s2460_s2] ss:$0 sm:$0xff] }
   0x4   :  { %s2492_s24 = sld [smem:[#allocation3_spill]]  ;;  %s2487_s3 = smov 104  }
   0x5   :  { %s1843_s30 = smov 80   ;;  %s1844_s18 = smov 112  }
   0x6   :  { %s2478_s1 = smov 40   ;;  %s2486_s2 = smov 56  }
   0x7   :  { %s2477_s19 = smov 48   ;;  %s2480_s4 = smov 8  }
   0x8   :  { %s2482_s20 = smov 24  }
   0x9   :  { %v81_v0 = vld [vmem:[%s2491_s26 + $0x18] sm:$0xff]  ;;  %v80_v1 = vld [vmem:[%s2491_s26 + $0x10] sm:$0xff]  ;;  %v79_v2 = vld [vmem:[%s2491_s26 + $0x8] sm:$0xff] }
   0xa   :  { %105 = vmatpush.msra.mxu0 %v81_v0  ;;  %v78_v3 = vld [vmem:[%s2491_s26] sm:$0xff] }
   0xb   :  { %v1729_v7 = vld [vmem:[%s2492_s24] ss:$0 sm:$0xff] }
   0xc   :  { %106 = vmatpush.msra.mxu0 %v80_v1 }
   0xe   :  { %107 = vmatpush.msra.mxu0 %v79_v2 }
  0x10   :  { %108 = vmatpush.msra.mxu0 %v78_v3 }
  0x11   :  { %1574 = vmatmul.msk.f32.vlgmr.msra.gmra.mxu0 %vm86_vm0, %v1959_v4 }
  0x19   :  { %1575 = vmatmul.msk.f32.gmra.mxu0 %vm86_vm0, %v1966_v5 }
  0x75   :  { %v64_v29 = vpop.permute.xlu1 %63 }
  0x76   :  { %vm74_vm2 = vcmp.eq.f32.partialorder %v64_v29, %v1730_v28 }
  0x77   :  { %v2027_v31 = vsel %vm74_vm2, 0.0, %v1846_v30 }
  0x8e   :  { %v110_v6 = vpop.f32.mrf.mxu0 }
  0x8f   :  { %v1979_v10 = vadd.f32 %v1729_v7, %v110_v6 }
  0x96   :  { %v113_v8 = vpop.f32.mrf.mxu0 }
  0x97   :  { %v1973_v9 = vadd.f32 %v1729_v7, %v113_v8 }
  0x99   :  { %222 = vrot.lane.b32.xlu2 %v1973_v9, %s1837_s25  ;;  %120 = vrot.lane.b32.xlu0 %v1973_v9, %s1838_s27  ;;  %v1995_v11 = vpack.i.bf16 %v1979_v10, %v1973_v9 }
  0xa1   :  { %220 = vrot.lane.b32.xlu2 %v1979_v10, %s1837_s25  ;;  %118 = vrot.lane.b32.xlu0 %v1979_v10, %s1838_s27 }
  0xa9   :  { %218 = vrot.lane.b32.xlu2 %v1973_v9, %s1839_s0  ;;  %216 = vrot.lane.b32.xlu0 %v1979_v10, %s1839_s0 }
  0xb1   :  { %422 = vrot.lane.b32.xlu2 %v1973_v9, %s1840_s28 }
  0xb9   :  { %420 = vrot.lane.b32.xlu2 %v1979_v10, %s1840_s28 }
  0xc1   :  { %1689 = vrot.lane.b32.xlu2 %v1995_v11, %s2479_s29 }
  0xc9   :  { %416 = vrot.lane.b32.xlu2 %v1979_v10, %s2487_s3 }
  0xd1   :  { %320 = vrot.lane.b32.xlu2 %v1979_v10, %s1843_s30 }
  0xd9   :  { %418 = vrot.lane.b32.xlu2 %v1973_v9, %s2487_s3 }
  0xe1   :  { %318 = vrot.lane.b32.xlu2 %v1973_v9, %s1844_s18 }
  0xf3   :  { %v223_v12 = vpop.permute.xlu2 %222 }
  0xf4   :  { %1582 = vmatpush.xpose.msk.msra.mxu3 %vm122_vm1, %v223_v12 }
  0xfb   :  { %v221_v13 = vpop.permute.xlu2 %220 }
  0xfc   :  { %1583 = vmatpush.xpose.msk.msra.mxu3 %vm122_vm1, %v221_v13 }
 0x103   :  { %v219_v16 = vpop.permute.xlu2 %218 }
 0x10b   :  { %v121_v17 = vpop.permute.xlu0 %120  ;;  %v423_v18 = vpop.permute.xlu2 %422 }
 0x10c   :  { %1576 = vmatpush.xpose.msk.msra.mxu1 %vm122_vm1, %v121_v17  ;;  %1594 = vmatpush.xpose.msk.msrb.mxu3 %vm122_vm1, %v423_v18 }
 0x113   :  { %v421_v19 = vpop.permute.xlu2 %420  ;;  %v119_v20 = vpop.permute.xlu0 %118 }
 0x114   :  { %1577 = vmatpush.xpose.msk.msra.mxu1 %vm122_vm1, %v119_v20  ;;  %1595 = vmatpush.xpose.msk.msrb.mxu3 %vm122_vm1, %v421_v19 }
 0x117   :  { %1578 = vmatmul.msk.f32.vlgmr.msra.gmra.mxu1 %vm122_vm1, %v1979_v10 }
 0x11b   :  { %v1690_v21 = vpop.permute.xlu2 %1689  ;;  %v217_v22 = vpop.permute.xlu0 %216 }
 0x11c   :  { %1584 = vmatmul.msk.f32.vlgmr.msra.gmra.mxu3 %vm122_vm1, %v217_v22  ;;  %v1691_v23 = vunpack.i.l.bf16 %v1690_v21  ;;  %v1692_v24 = vunpack.i.h.bf16 %v1690_v21 }
 0x11e   :  { %207 = vmatpush.msrb.mxu0 %v1691_v23  ;;  %1668 = vmatpush.msra.mxu2 %v1691_v23 }
 0x11f   :  { %1579 = vmatmul.msk.f32.gmra.mxu1 %vm122_vm1, %v1973_v9 }
 0x120   :  { %208 = vmatpush.msrb.mxu0 %v1692_v24  ;;  %1669 = vmatpush.msra.mxu2 %v1692_v24 }
 0x123   :  { %v417_v25 = vpop.permute.xlu2 %416 }
 0x124   :  { %1585 = vmatmul.msk.f32.gmra.mxu3 %vm122_vm1, %v219_v16 }
 0x12b   :  { %v321_v26 = vpop.permute.xlu2 %320 }
 0x12c   :  { %1596 = vmatmul.msk.f32.vlgmr.msrb.gmra.mxu3 %vm122_vm1, %v417_v25 }
 0x133   :  { %v419_v27 = vpop.permute.xlu2 %418 }
 0x134   :  { %1597 = vmatmul.msk.f32.gmra.mxu3 %vm122_vm1, %v419_v27 }
 0x13b   :  { %v319_v12 = vpop.permute.xlu2 %318 }
 0x194   :  { %v148_v32 = vpop.f32.mrf.mxu1 }
 0x195   :  { %v154_v33 = vmul.f32 0.35355338, %v148_v32 }
 0x197   :  { %v156_v34 = vadd.f32 %v154_v33, %v2027_v31 }
 0x199   :  { %v159_v35 = vsel %vm158_vm3, %v156_v34, -inf }
 0x19a   :  { %160 = vmax.xlane.f32.xlu1 %v159_v35 }
 0x19c   :  { %v151_v48 = vpop.f32.mrf.mxu1 }
 0x19d   :  { %v155_v50 = vmul.f32 0.35355338, %v151_v48 }
 0x19f   :  { %v249_v37 = vpop.f32.mrf.mxu3 }
 0x1a0   :  { %v255_v38 = vmul.f32 0.35355338, %v249_v37 }
 0x1a2   :  { %v257_v39 = vadd.f32 %v255_v38, %v2027_v31 }
 0x1a4   :  { %v259_v40 = vsel %vm158_vm3, %v257_v39, -inf }
 0x1a7   :  { %v252_v46 = vpop.f32.mrf.mxu3 }
 0x1a8   :  { %v256_v58 = vmul.f32 0.35355338, %v252_v46 }
 0x1af   :  { %v449_v51 = vpop.f32.mrf.mxu3 }
 0x1b0   :  { %v455_v54 = vmul.f32 0.35355338, %v449_v51 }
 0x1b2   :  { %v457_v56 = vadd.f32 %v455_v54, %v2027_v31 }
 0x1b3   :  { %322 = vrot.lane.b32.xlu1 %v1973_v9, %s1843_s30 }
 0x1b4   :  { %v459_v57 = vsel %vm158_vm3, %v457_v56, -inf }
 0x1b7   :  { %v452_v60 = vpop.f32.mrf.mxu3 }
 0x1b8   :  { %v456_v63 = vmul.f32 0.35355338, %v452_v60 }
 0x1bb   :  { %68 = vperm.xlu1 %1687, %v59_v36  }
 0x1e5   :  { %260 = vmax.xlane.f32.xlu1 %v259_v40 }
 0x20d   :  { %v161_v41 = vpop.xlane.xlu1 %160 }
 0x20e   :  { %v165_v42 = vsub.f32 %v156_v34, %v161_v41 }
 0x210   :  { %v167_v43 = vmul.f32 1.442695, %v165_v42 }
 0x212   :  { %1747 = vpow2.f32 %v167_v43 }
 0x218   :  { %v1748_v44 = vpop.eup %1747 }
 0x219   :  { %v171_v45 = vsel %vm158_vm3, %v1748_v44, 0.0 }
 0x21a   :  { %172 = vadd.xlane.f32.xlu0 %v171_v45 }
 0x225   :  { %v323_v47 = vpop.permute.xlu1 %322 }
 0x226   :  { %1588 = vmatpush.xpose.msk.msra.mxu0 %vm122_vm1, %v323_v47 }
 0x22a   :  { %1589 = vmatpush.xpose.msk.msra.mxu0 %vm122_vm1, %v321_v26 }
 0x22d   :  { %v69_v49 = vpop.permute.xlu1 %68 }
 0x22e   :  { %vm75_vm4 = vcmp.eq.f32.partialorder %v69_v49, %v1730_v28  ;;  %316 = vrot.lane.b32.xlu0 %v1979_v10, %s1844_s18 }
 0x22f   :  { %v2043_v52 = vsel %vm75_vm4, 0.0, %v1846_v30 }
 0x230   :  { %v157_v53 = vadd.f32 %v155_v50, %v2043_v52  ;;  %v258_v59 = vadd.f32 %v256_v58, %v2043_v52  ;;  %v458_v2 = vadd.f32 %v456_v63, %v2043_v52 }
 0x232   :  { %v162_v55 = vsel %vm158_vm3, %v157_v53, -inf  ;;  %v262_v61 = vsel %vm158_vm3, %v258_v59, -inf  ;;  %v462_v3 = vsel %vm158_vm3, %v458_v2, -inf }
 0x233   :  { %163 = vmax.xlane.f32.xlu2 %v162_v55 }
 0x23b   :  { %460 = vmax.xlane.f32.xlu2 %v459_v57 }
 0x258   :  { %v261_v62 = vpop.xlane.xlu1 %260  ;;  %263 = vmax.xlane.f32.xlu0 %v262_v61 }
 0x259   :  { %v265_v0 = vsub.f32 %v257_v39, %v261_v62 }
 0x25b   :  { %v267_v1 = vmul.f32 1.442695, %v265_v0 }
 0x25d   :  { %1749 = vpow2.f32 %v267_v1 }
 0x260   :  { %463 = vmax.xlane.f32.xlu0 %v462_v3 }
 0x263   :  { %v2053_v6 = vpop.eup %1749 }
 0x264   :  { %v271_v7 = vsel %vm158_vm3, %v2053_v6, 0.0 }
 0x268   :  { %272 = vadd.xlane.f32.xlu0 %v271_v7 }
 0x28d   :  { %v173_v8 = vpop.xlane.xlu0 %172 }
 0x28e   :  { %1751 = vrcp.f32 %v173_v8 }
 0x294   :  { %v1752_v9 = vpop.eup %1751 }
 0x295   :  { %v179_v10 = vmul.f32 %v1752_v9, %v1748_v44 }
 0x297   :  { %1580 = vmatmul.msk.f32.vlgmr.msrb.gmra.mxu0 %vm158_vm3, %v179_v10 }
 0x2a0   :  { %v317_v13 = vpop.permute.xlu0 %316 }
 0x2a1   :  { %1590 = vmatmul.msk.f32.vlgmr.msra.gmra.mxu0 %vm122_vm1, %v317_v13 }
 0x2a6   :  { %v164_v14 = vpop.xlane.xlu2 %163 }
 0x2a7   :  { %v166_v21 = vsub.f32 %v157_v53, %v164_v14 }
 0x2a9   :  { %1591 = vmatmul.msk.f32.gmra.mxu0 %vm122_vm1, %v319_v12  ;;  %v169_v23 = vmul.f32 1.442695, %v166_v21 }
 0x2ae   :  { %v461_v15 = vpop.xlane.xlu2 %460 }
 0x2af   :  { %v465_v16 = vsub.f32 %v457_v56, %v461_v15 }
 0x2b1   :  { %v467_v17 = vmul.f32 1.442695, %v465_v16 }
 0x2b3   :  { %1753 = vpow2.f32 %v467_v17 }
 0x2b4   :  { %1755 = vpow2.f32 %v169_v23 }
 0x2b9   :  { %v2060_v18 = vpop.eup %1753 }
 0x2ba   :  { %v471_v19 = vsel %vm158_vm3, %v2060_v18, 0.0  ;;  %v1756_v34 = vpop.eup %1755 }
 0x2bb   :  { %472 = vadd.xlane.f32.xlu0 %v471_v19  ;;  %v174_v37 = vsel %vm158_vm3, %v1756_v34, 0.0 }
 0x2cb   :  { %v264_v22 = vpop.xlane.xlu0 %263 }
 0x2cc   :  { %v266_v27 = vsub.f32 %v258_v59, %v264_v22 }
 0x2ce   :  { %v269_v29 = vmul.f32 1.442695, %v266_v27 }
 0x2cf   :  { %1699 = vrot.lane.b32.xlu0 %v1995_v11, %s2478_s1  ;;  %s2500_s1 = smov 24  }
 0x2d0   :  { %1757 = vpow2.f32 %v269_v29  ;;  %v550_v29 = vld [vmem:[%s2462_s5 + $0x18] sm:$0xff] }
 0x2d1   :  { %573 = vmatpush.msrb.mxu0 %v550_v29  ;;  %v1732_v29 = vld [vmem:[%s2464_s7] ss:$0 sm:$0xff] }
 0x2d3   :  { %v464_v32 = vpop.xlane.xlu0 %463 }
 0x2d4   :  { %v466_v36 = vsub.f32 %v458_v2, %v464_v32  ;;  %v548_v32 = vld [vmem:[%s2462_s5 + $0x8] sm:$0xff] }
 0x2d6   :  { %v469_v39 = vmul.f32 1.442695, %v466_v36  ;;  %v1758_v40 = vpop.eup %1757 }
 0x2d7   :  { %v274_v41 = vsel %vm158_vm3, %v1758_v40, 0.0 }
 0x2d8   :  { %1759 = vpow2.f32 %v469_v39 }
 0x2db   :  { %v273_v45 = vpop.xlane.xlu0 %272 }
 0x2de   :  { %v1760_v42 = vpop.eup %1759 }
 0x2df   :  { %v474_v43 = vsel %vm158_vm3, %v1760_v42, 0.0 }
 0x314   :  { %v2066_v20 = vpop.f32.mrf.mxu0 }
 0x31e   :  { %v349_v24 = vpop.f32.mrf.mxu0 }
 0x31f   :  { %v355_v25 = vmul.f32 0.35355338, %v349_v24 }
 0x321   :  { %v357_v26 = vadd.f32 %v355_v25, %v2027_v31 }
 0x323   :  { %v359_v28 = vsel %vm158_vm3, %v357_v26, -inf }
 0x324   :  { %360 = vmax.xlane.f32.xlu1 %v359_v28 }
 0x326   :  { %v352_v30 = vpop.f32.mrf.mxu0 }
 0x327   :  { %v356_v33 = vmul.f32 0.35355338, %v352_v30  ;;  %v549_v30 = vld [vmem:[%s2462_s5 + $0x10] sm:$0xff] }
 0x328   :  { %574 = vmatpush.msrb.mxu0 %v549_v30 }
 0x329   :  { %v358_v35 = vadd.f32 %v356_v33, %v2043_v52 }
 0x32a   :  { %575 = vmatpush.msrb.mxu0 %v548_v32 }
 0x32b   :  { %v362_v38 = vsel %vm158_vm3, %v358_v35, -inf }
 0x32c   :  { %175 = vadd.xlane.f32.xlu1 %v174_v37  ;;  %363 = vmax.xlane.f32.xlu2 %v362_v38 }
 0x32e   :  { %v473_v50 = vpop.xlane.xlu0 %472 }
 0x334   :  { %275 = vadd.xlane.f32.xlu1 %v274_v41 }
 0x33c   :  { %475 = vadd.xlane.f32.xlu1 %v474_v43 }
 0x341   :  { %v1700_v58 = vpop.permute.xlu0 %1699 }
 0x342   :  { %v1701_v62 = vunpack.i.l.bf16 %v1700_v58  ;;  %v1702_v2 = vunpack.i.h.bf16 %v1700_v58 }
 0x344   :  { %1694 = vrot.lane.b32.xlu2 %v1995_v11, %s2486_s2 }
 0x34c   :  { %1704 = vrot.lane.b32.xlu2 %v1995_v11, %s2477_s19 }
 0x397   :  { %v361_v44 = vpop.xlane.xlu1 %360 }
 0x398   :  { %v365_v46 = vsub.f32 %v357_v26, %v361_v44 }
 0x39a   :  { %v367_v47 = vmul.f32 1.442695, %v365_v46 }
 0x39c   :  { %1761 = vpow2.f32 %v367_v47 }
 0x39f   :  { %v176_v48 = vpop.xlane.xlu1 %175  ;;  %v364_v49 = vpop.xlane.xlu2 %363 }
 0x3a0   :  { %1763 = vrcp.f32 %v176_v48  ;;  %v366_v51 = vsub.f32 %v358_v35, %v364_v49  ;;  %v547_v35 = vld [vmem:[%s2462_s5] sm:$0xff] }
 0x3a1   :  { %576 = vmatpush.msrb.mxu0 %v547_v35 }
 0x3a2   :  { %v1762_v53 = vpop.eup %1761  ;;  %v369_v54 = vmul.f32 1.442695, %v366_v51 }
 0x3a3   :  { %v371_v55 = vsel %vm158_vm3, %v1762_v53, 0.0 }
 0x3a4   :  { %1765 = vpow2.f32 %v369_v54  ;;  %372 = vadd.xlane.f32.xlu1 %v371_v55 }
 0x3a5   :  { %1767 = vrcp.f32 %v273_v45 }
 0x3a6   :  { %v1764_v56 = vpop.eup %1763 }
 0x3a7   :  { %v1695_v57 = vpop.permute.xlu2 %1694  ;;  %v180_v11 = vmul.f32 %v1764_v56, %v1756_v34  ;;  %v276_v63 = vpop.xlane.xlu1 %275 }
 0x3a8   :  { %v1696_v59 = vunpack.i.l.bf16 %v1695_v57  ;;  %v1697_v61 = vunpack.i.h.bf16 %v1695_v57  ;;  %1769 = vrcp.f32 %v276_v63  ;;  %v1853_v57 = vmov 32.0  }
 0x3a9   :  { %1581 = vmatmul.msk.f32.vlgmr.msra.gmra.mxu2 %vm158_vm3, %v180_v11  ;;  %1771 = vrcp.f32 %v473_v50 }
 0x3aa   :  { %v1766_v60 = vpop.eup %1765  ;;  %307 = vmatpush.msrb.mxu2 %v1696_v59 }
 0x3ab   :  { %v374_v0 = vsel %vm158_vm3, %v1766_v60, 0.0  ;;  %v1768_v1 = vpop.eup %1767 }
 0x3ac   :  { %308 = vmatpush.msrb.mxu2 %v1697_v61  ;;  %375 = vadd.xlane.f32.xlu1 %v374_v0  ;;  %v279_v7 = vmul.f32 %v1768_v1, %v2053_v6 }
 0x3ae   :  { %507 = vmatpush.msra.mxu2 %v1701_v62  ;;  %v1770_v10 = vpop.eup %1769 }
 0x3af   :  { %v1705_v3 = vpop.permute.xlu2 %1704  ;;  %v280_v12 = vmul.f32 %v1770_v10, %v1758_v40  ;;  %v476_v13 = vpop.xlane.xlu1 %475  ;;  %v652_v10 = vld [vmem:[%s2467_s9 + $0x18] sm:$0xff] }
 0x3b0   :  { %508 = vmatpush.msra.mxu2 %v1702_v2  ;;  %v1706_v8 = vunpack.i.l.bf16 %v1705_v3  ;;  %v1707_v9 = vunpack.i.h.bf16 %v1705_v3  ;;  %v1772_v14 = vpop.eup %1771  ;;  %1773 = vrcp.f32 %v476_v13  ;;  %v650_v13 = vld [vmem:[%s2467_s9 + $0x8] sm:$0xff] }
 0x3b1   :  { %1586 = vmatmul.msk.f32.vlgmr.msrb.gmra.mxu2 %vm158_vm3, %v279_v7  ;;  %v479_v15 = vmul.f32 %v1772_v14, %v2060_v18  ;;  %v649_v14 = vld [vmem:[%s2467_s9] sm:$0xff] }
 0x3b2   :  { %407 = vmatpush.msrb.mxu1 %v1706_v8 }
 0x3b4   :  { %408 = vmatpush.msrb.mxu1 %v1707_v9 }
 0x3b6   :  { %v1774_v16 = vpop.eup %1773  ;;  %675 = vmatpush.msra.mxu1 %v652_v10 }
 0x3b7   :  { %v480_v6 = vmul.f32 %v1774_v16, %v1760_v42 }
 0x3b9   :  { %1587 = vmatmul.msk.f32.gmra.mxu2 %vm158_vm3, %v280_v12  ;;  %v651_v12 = vld [vmem:[%s2467_s9 + $0x10] sm:$0xff] }
 0x3ba   :  { %676 = vmatpush.msra.mxu1 %v651_v12 }
 0x3bc   :  { %677 = vmatpush.msra.mxu1 %v650_v13  ;;  %v1735_v13 = vld [vmem:[%s2468_s12] ss:$0 sm:$0xff] }
 0x3be   :  { %678 = vmatpush.msra.mxu1 %v649_v14 }
 0x3c1   :  { %1598 = vmatmul.msk.f32.vlgmr.msra.gmra.mxu2 %vm158_vm3, %v479_v15 }
 0x3c9   :  { %1599 = vmatmul.msk.f32.gmra.mxu2 %vm158_vm3, %v480_v6 }
 0x417   :  { %v373_v17 = vpop.xlane.xlu1 %372 }
 0x418   :  { %1775 = vrcp.f32 %v373_v17 }
 0x41e   :  { %v1776_v19 = vpop.eup %1775 }
 0x41f   :  { %v376_v21 = vpop.xlane.xlu1 %375  ;;  %v379_v22 = vmul.f32 %v1776_v19, %v1762_v53 }
 0x420   :  { %1777 = vrcp.f32 %v376_v21 }
 0x421   :  { %1592 = vmatmul.msk.f32.vlgmr.msrb.gmra.mxu1 %vm158_vm3, %v379_v22  ;;  %1779 = vrcp.f32 %v1853_v57 }
 0x426   :  { %v1778_v23 = vpop.eup %1777 }
 0x427   :  { %v380_v24 = vmul.f32 %v1778_v23, %v1766_v60  ;;  %v1780_v11 = vpop.eup %1779 }
 0x428   :  { %v595_v58 = vmul.f32 32.0, %v1780_v11  ;;  %vm599_vm6 = vweird.f32 %v1780_v11 }
 0x429   :  { %1593 = vmatmul.msk.f32.gmra.mxu1 %vm158_vm3, %v380_v24 }
 0x42a   :  { %v596_v59 = vsub.f32 1.0, %v595_v58 }
 0x42c   :  { %v213_v25 = vpop.f32.mrf.mxu2  ;;  %v597_v60 = vmul.f32 %v1780_v11, %v596_v59 }
 0x42e   :  { %v598_v61 = vadd.f32 %v1780_v11, %v597_v60 }
 0x430   :  { %v2124_v62 = vsel %vm599_vm6, %v1780_v11, %v598_v61 }
 0x434   :  { %v310_v18 = vpop.f32.mrf.mxu2 }
 0x435   :  { %518 = vrot.lane.b32.xlu2 %v310_v18, %s2480_s4 }
 0x43c   :  { %v313_v26 = vpop.f32.mrf.mxu2 }
 0x43d   :  { %520 = vrot.lane.b32.xlu2 %v313_v26, %s2480_s4  ;;  %s2484_s4 = smov 16  }
 0x444   :  { %v510_v27 = vpop.f32.mrf.mxu2 }
 0x445   :  { %534 = vrot.lane.b32.xlu1 %v510_v27, %s2482_s20 }
 0x44c   :  { %v513_v28 = vpop.f32.mrf.mxu2 }
 0x44d   :  { %536 = vrot.lane.b32.xlu2 %v513_v28, %s2482_s20 }
 0x48f   :  { %v519_v36 = vpop.permute.xlu2 %518 }
 0x490   :  { %v540_v37 = vsel %vm122_vm1, %v2066_v20, %v519_v36  ;;  %v1731_v20 = vld [vmem:[%s2463_s6] ss:$0 sm:$0xff] }
 0x497   :  { %v521_v39 = vpop.permute.xlu2 %520 }
 0x498   :  { %v541_v43 = vsel %vm122_vm1, %v213_v25, %v521_v39 }
 0x49e   :  { %v410_v33 = vpop.f32.mrf.mxu1 }
 0x49f   :  { %526 = vrot.lane.b32.xlu0 %v410_v33, %s2484_s4 }
 0x4a6   :  { %v413_v34 = vpop.f32.mrf.mxu1 }
 0x4a7   :  { %528 = vrot.lane.b32.xlu0 %v413_v34, %s2484_s4  ;;  %v537_v45 = vpop.permute.xlu2 %536  ;;  %v1733_v34 = vld [vmem:[%s2465_s8] ss:$0 sm:$0xff] }
 0x4b7   :  { %v535_v40 = vpop.permute.xlu1 %534 }
 0x511   :  { %v527_v38 = vpop.permute.xlu0 %526 }
 0x512   :  { %v542_v41 = vsel %vm158_vm3, %v540_v37, %v527_v38 }
 0x513   :  { %v545_v42 = vsel %vm544_vm5, %v542_v41, %v535_v40 }
 0x514   :  { %1600 = vmatmul.msk.f32.vlgmr.msrb.gmra.mxu0 %vm86_vm0, %v545_v42 }
 0x519   :  { %v529_v44 = vpop.permute.xlu0 %528 }
 0x51a   :  { %v543_v46 = vsel %vm158_vm3, %v541_v43, %v529_v44  ;;  %v711_v44 = vld [vmem:[%s2469_s11 + $0x38] sm:$0xff] }
 0x51b   :  { %v546_v47 = vsel %vm544_vm5, %v543_v46, %v537_v45  ;;  %731 = vmatpush.msra.mxu3 %v711_v44  ;;  %v710_v45 = vld [vmem:[%s2469_s11 + $0x30] sm:$0xff]  ;;  %v709_v46 = vld [vmem:[%s2469_s11 + $0x28] sm:$0xff] }
 0x51c   :  { %1601 = vmatmul.msk.f32.gmra.mxu0 %vm86_vm0, %v546_v47  ;;  %v708_v47 = vld [vmem:[%s2469_s11 + $0x20] sm:$0xff] }
 0x51d   :  { %732 = vmatpush.msra.mxu3 %v710_v45 }
 0x51f   :  { %733 = vmatpush.msra.mxu3 %v709_v46 }
 0x521   :  { %734 = vmatpush.msra.mxu3 %v708_v47 }
 0x591   :  { %v578_v48 = vpop.f32.mrf.mxu0 }
 0x592   :  { %v579_v49 = vadd.f32 %v1731_v20, %v578_v48  ;;  %v706_v48 = vld [vmem:[%s2469_s11 + $0x10] sm:$0xff] }
 0x594   :  { %v584_v50 = vadd.f32 %v579_v49, %v1959_v4  ;;  %v705_v49 = vld [vmem:[%s2469_s11 + $0x8] sm:$0xff] }
 0x596   :  { %v588_v51 = vsel %vm86_vm0, %v584_v50, 0.0 }
 0x597   :  { %589 = vadd.xlane.f32.xlu0 %v588_v51  ;;  %v1734_v51 = vld [vmem:[%s2466_s10] ss:$0 sm:$0xff] }
 0x599   :  { %v581_v53 = vpop.f32.mrf.mxu0 }
 0x59a   :  { %v582_v54 = vadd.f32 %v1731_v20, %v581_v53  ;;  %v707_v20 = vld [vmem:[%s2469_s11 + $0x18] sm:$0xff] }
 0x59b   :  { %735 = vmatpush.msra.mxu3 %v707_v20 }
 0x59c   :  { %v585_v55 = vadd.f32 %v582_v54, %v1966_v5 }
 0x59d   :  { %736 = vmatpush.msra.mxu3 %v706_v48 }
 0x59e   :  { %v591_v56 = vsel %vm86_vm0, %v585_v55, 0.0 }
 0x59f   :  { %592 = vadd.xlane.f32.xlu2 %v591_v56  ;;  %737 = vmatpush.msra.mxu3 %v705_v49 }
 0x60a   :  { %v590_v4 = vpop.xlane.xlu0 %589 }
 0x60b   :  { %v601_v63 = vmul.f32 %v2124_v62, %v590_v4 }
 0x60d   :  { %v603_v0 = vsub.f32 %v584_v50, %v601_v63  ;;  %v704_v50 = vld [vmem:[%s2469_s11] sm:$0xff] }
 0x60e   :  { %738 = vmatpush.msra.mxu3 %v704_v50  ;;  %v1736_v50 = vld [vmem:[%s2470_s13] ss:$0 sm:$0xff] }
 0x60f   :  { %v605_v1 = vmul.f32 %v603_v0, %v603_v0 }
 0x611   :  { %v607_v5 = vsel %vm86_vm0, %v605_v1, 0.0 }
 0x612   :  { %608 = vadd.xlane.f32.xlu1 %v607_v5  ;;  %v593_v2 = vpop.xlane.xlu2 %592 }
 0x613   :  { %v602_v3 = vmul.f32 %v2124_v62, %v593_v2 }
 0x615   :  { %v604_v7 = vsub.f32 %v585_v55, %v602_v3 }
 0x617   :  { %v606_v8 = vmul.f32 %v604_v7, %v604_v7 }
 0x619   :  { %v610_v9 = vsel %vm86_vm0, %v606_v8, 0.0 }
 0x61a   :  { %611 = vadd.xlane.f32.xlu0 %v610_v9 }
 0x685   :  { %v609_v15 = vpop.xlane.xlu1 %608 }
 0x686   :  { %v613_v16 = vmul.f32 %v609_v15, %v2124_v62 }
 0x688   :  { %v615_v6 = vadd.f32 1e-12, %v613_v16 }
 0x68a   :  { %1781 = vrsqrt.f32 %v615_v6  ;;  %vm623_vm8 = vweird.f32 %v615_v6 }
 0x68d   :  { %v612_v17 = vpop.xlane.xlu0 %611 }
 0x68e   :  { %v614_v19 = vmul.f32 %v612_v17, %v2124_v62 }
 0x690   :  { %v1782_v21 = vpop.eup %1781  ;;  %v616_v22 = vadd.f32 1e-12, %v614_v19 }
 0x691   :  { %v618_v23 = vmul.f32 %v1782_v21, %v615_v6  ;;  %vm624_vm7 = vweird.f32 %v1782_v21 }
 0x692   :  { %1783 = vrsqrt.f32 %v616_v22  ;;  %vm625_vm9 = vmor %vm623_vm8, %vm624_vm7  ;;  %vm633_vm11 = vweird.f32 %v616_v22 }
 0x693   :  { %v619_v24 = vmul.f32 %v1782_v21, %v618_v23 }
 0x695   :  { %v620_v25 = vmul.f32 0.5, %v619_v24 }
 0x697   :  { %v621_v18 = vsub.f32 1.5, %v620_v25 }
 0x698   :  { %v1784_v26 = vpop.eup %1783 }
 0x699   :  { %v622_v27 = vmul.f32 %v1782_v21, %v621_v18  ;;  %v628_v28 = vmul.f32 %v1784_v26, %v616_v22  ;;  %vm634_vm10 = vweird.f32 %v1784_v26 }
 0x69a   :  { %vm635_vm12 = vmor %vm633_vm11, %vm634_vm10 }
 0x69b   :  { %v626_v30 = vsel %vm625_vm9, %v1782_v21, %v622_v27  ;;  %v629_v32 = vmul.f32 %v1784_v26, %v628_v28 }
 0x69c   :  { %v637_v33 = vmul.f32 %v626_v30, %v603_v0 }
 0x69d   :  { %v630_v35 = vmul.f32 0.5, %v629_v32 }
 0x69e   :  { %v642_v36 = vmul.f32 %v1732_v29, %v637_v33  ;;  %v1609_v33 = vld [vmem:[%s2491_s26 + $0x38] sm:$0xff] }
 0x69f   :  { %v631_v37 = vsub.f32 1.5, %v630_v35  ;;  %832 = vmatpush.msrb.mxu2 %v1609_v33  ;;  %v1607_v35 = vld [vmem:[%s2491_s26 + $0x28] sm:$0xff] }
 0x6a0   :  { %v647_v38 = vadd.f32 %v1733_v34, %v642_v36  ;;  %v1606_v36 = vld [vmem:[%s2491_s26 + $0x20] sm:$0xff] }
 0x6a1   :  { %v632_v39 = vmul.f32 %v1784_v26, %v631_v37 }
 0x6a2   :  { %1602 = vmatmul.msk.f32.vlgmr.msra.gmra.mxu1 %vm86_vm0, %v647_v38 }
 0x6a3   :  { %v636_v40 = vsel %vm635_vm12, %v1784_v26, %v632_v39 }
 0x6a4   :  { %v638_v41 = vmul.f32 %v636_v40, %v604_v7 }
 0x6a6   :  { %v643_v42 = vmul.f32 %v1732_v29, %v638_v41 }
 0x6a8   :  { %v648_v43 = vadd.f32 %v1733_v34, %v643_v42  ;;  %v1608_v34 = vld [vmem:[%s2491_s26 + $0x30] sm:$0xff] }
 0x6a9   :  { %833 = vmatpush.msrb.mxu2 %v1608_v34 }
 0x6aa   :  { %1603 = vmatmul.msk.f32.gmra.mxu1 %vm86_vm0, %v648_v43 }
 0x6ab   :  { %834 = vmatpush.msrb.mxu2 %v1607_v35 }
 0x6ad   :  { %835 = vmatpush.msrb.mxu2 %v1606_v36 }
 0x71f   :  { %v680_v53 = vpop.f32.mrf.mxu1 }
 0x720   :  { %v681_v54 = vadd.f32 %v1734_v51, %v680_v53 }
 0x722   :  { %v686_v55 = vmul.f32 %v681_v54, %v681_v54 }
 0x724   :  { %v688_v56 = vmul.f32 %v686_v55, %v681_v54  ;;  %v1737_v55 = vld [vmem:[%s2471_s14] ss:$0 sm:$0xff] }
 0x726   :  { %v690_v57 = vmul.f32 0.044715, %v688_v56 }
 0x727   :  { %v683_v11 = vpop.f32.mrf.mxu1 }
 0x728   :  { %v692_v58 = vadd.f32 %v690_v57, %v681_v54  ;;  %v684_v59 = vadd.f32 %v1734_v51, %v683_v11 }
 0x72a   :  { %v694_v60 = vmul.f32 0.7978846, %v692_v58  ;;  %v687_v61 = vmul.f32 %v684_v59, %v684_v59 }
 0x72c   :  { %1785 = vtanh.f32 %v694_v60  ;;  %v689_v4 = vmul.f32 %v687_v61, %v684_v59 }
 0x72e   :  { %v691_v63 = vmul.f32 0.044715, %v689_v4 }
 0x730   :  { %v693_v0 = vadd.f32 %v691_v63, %v684_v59 }
 0x732   :  { %v1786_v1 = vpop.eup %1785  ;;  %v695_v5 = vmul.f32 0.7978846, %v693_v0  ;;  %v1738_v0 = vld [vmem:[%s2492_s24 + $0x1] ss:$0 sm:$0xff]  ;;  %s2493_s24 = smov 104  }
 0x733   :  { %v698_v2 = vadd.f32 1.0, %v1786_v1 }
 0x734   :  { %1787 = vtanh.f32 %v695_v5 }
 0x735   :  { %v700_v3 = vmul.f32 0.5, %v698_v2 }
 0x737   :  { %v702_v7 = vmul.f32 %v700_v3, %v681_v54 }
 0x739   :  { %1604 = vmatmul.msk.f32.vlgmr.msra.gmra.mxu3 %vm716_vm13, %v702_v7 }
 0x73a   :  { %v1788_v8 = vpop.eup %1787 }
 0x73b   :  { %v699_v9 = vadd.f32 1.0, %v1788_v8 }
 0x73d   :  { %v701_v10 = vmul.f32 0.5, %v699_v9 }
 0x73f   :  { %v703_v12 = vmul.f32 %v701_v10, %v684_v59 }
 0x741   :  { %1605 = vmatmul.msk.f32.gmra.mxu3 %vm716_vm13, %v703_v12 }
 0x7bc   :  { %v740_v14 = vpop.f32.mrf.mxu3 }
 0x7bd   :  { %v741_v15 = vadd.f32 %v1735_v13, %v740_v14 }
 0x7bf   :  { %v746_v16 = vadd.f32 %v741_v15, %v647_v38 }
 0x7c1   :  { %v750_v6 = vsel %vm86_vm0, %v746_v16, 0.0 }
 0x7c2   :  { %751 = vadd.xlane.f32.xlu2 %v750_v6 }
 0x7c4   :  { %v743_v17 = vpop.f32.mrf.mxu3 }
 0x7c5   :  { %v744_v19 = vadd.f32 %v1735_v13, %v743_v17 }
 0x7c7   :  { %v747_v21 = vadd.f32 %v744_v19, %v648_v43 }
 0x7c9   :  { %v753_v22 = vsel %vm86_vm0, %v747_v21, 0.0 }
 0x7ca   :  { %754 = vadd.xlane.f32.xlu0 %v753_v22 }
 0x835   :  { %v752_v23 = vpop.xlane.xlu2 %751 }
 0x836   :  { %v756_v24 = vmul.f32 %v752_v23, %v2124_v62 }
 0x838   :  { %v758_v25 = vsub.f32 %v746_v16, %v756_v24 }
 0x83a   :  { %v760_v18 = vmul.f32 %v758_v25, %v758_v25 }
 0x83c   :  { %v762_v26 = vsel %vm86_vm0, %v760_v18, 0.0 }
 0x83d   :  { %v755_v27 = vpop.xlane.xlu0 %754  ;;  %763 = vadd.xlane.f32.xlu1 %v762_v26 }
 0x83e   :  { %v757_v28 = vmul.f32 %v755_v27, %v2124_v62 }
 0x840   :  { %v759_v29 = vsub.f32 %v747_v21, %v757_v28 }
 0x842   :  { %v761_v30 = vmul.f32 %v759_v29, %v759_v29 }
 0x844   :  { %v765_v32 = vsel %vm86_vm0, %v761_v30, 0.0 }
 0x845   :  { %766 = vadd.xlane.f32.xlu2 %v765_v32 }
 0x8b0   :  { %v764_v37 = vpop.xlane.xlu1 %763 }
 0x8b1   :  { %v768_v38 = vmul.f32 %v764_v37, %v2124_v62 }
 0x8b3   :  { %v770_v39 = vadd.f32 1e-12, %v768_v38 }
 0x8b5   :  { %1789 = vrsqrt.f32 %v770_v39  ;;  %vm778_vm15 = vweird.f32 %v770_v39 }
 0x8b8   :  { %v767_v40 = vpop.xlane.xlu2 %766 }
 0x8b9   :  { %v769_v41 = vmul.f32 %v767_v40, %v2124_v62 }
 0x8bb   :  { %v1790_v42 = vpop.eup %1789  ;;  %v771_v43 = vadd.f32 1e-12, %v769_v41 }
 0x8bc   :  { %v773_v44 = vmul.f32 %v1790_v42, %v770_v39  ;;  %vm779_vm14 = vweird.f32 %v1790_v42 }
 0x8bd   :  { %1791 = vrsqrt.f32 %v771_v43  ;;  %vm780_vm2 = vmor %vm778_vm15, %vm779_vm14  ;;  %vm788_vm6 = vweird.f32 %v771_v43 }
 0x8be   :  { %v774_v45 = vmul.f32 %v1790_v42, %v773_v44 }
 0x8c0   :  { %v775_v46 = vmul.f32 0.5, %v774_v45 }
 0x8c2   :  { %v776_v47 = vsub.f32 1.5, %v775_v46 }
 0x8c3   :  { %v1792_v20 = vpop.eup %1791 }
 0x8c4   :  { %v777_v48 = vmul.f32 %v1790_v42, %v776_v47  ;;  %v783_v49 = vmul.f32 %v1792_v20, %v771_v43  ;;  %vm789_vm4 = vweird.f32 %v1792_v20 }
 0x8c5   :  { %vm790_vm7 = vmor %vm788_vm6, %vm789_vm4  ;;  %vm1567_vm4 = vcmask 23552  }
 0x8c6   :  { %v781_v51 = vsel %vm780_vm2, %v1790_v42, %v777_v48  ;;  %v784_v53 = vmul.f32 %v1792_v20, %v783_v49 }
 0x8c7   :  { %v792_v54 = vmul.f32 %v781_v51, %v758_v25 }
 0x8c8   :  { %v785_v56 = vmul.f32 0.5, %v784_v53 }
 0x8c9   :  { %v797_v57 = vmul.f32 %v1736_v50, %v792_v54 }
 0x8ca   :  { %v786_v11 = vsub.f32 1.5, %v785_v56 }
 0x8cb   :  { %v2210_v58 = vadd.f32 %v1737_v55, %v797_v57 }
 0x8cc   :  { %v787_v59 = vmul.f32 %v1792_v20, %v786_v11 }
 0x8cd   :  { %1611 = vmatmul.msk.f32.vlgmr.msrb.gmra.mxu2 %vm86_vm0, %v2210_v58 }
 0x8ce   :  { %v791_v60 = vsel %vm790_vm7, %v1792_v20, %v787_v59 }
 0x8cf   :  { %v793_v61 = vmul.f32 %v791_v60, %v759_v29 }
 0x8d1   :  { %v798_v4 = vmul.f32 %v1736_v50, %v793_v61 }
 0x8d3   :  { %v2214_v63 = vadd.f32 %v1737_v55, %v798_v4 }
 0x8d5   :  { %1612 = vmatmul.msk.f32.gmra.mxu2 %vm86_vm0, %v2214_v63 }
 0x950   :  { %v837_v1 = vpop.f32.mrf.mxu2 }
 0x951   :  { %v2221_v5 = vadd.f32 %v1738_v0, %v837_v1 }
 0x953   :  { %941 = vrot.lane.b32.xlu2 %v2221_v5, %s1839_s0  ;;  %945 = vrot.lane.b32.xlu1 %v2221_v5, %s1837_s25 }
 0x958   :  { %v840_v2 = vpop.f32.mrf.mxu2 }
 0x959   :  { %v2227_v3 = vadd.f32 %v1738_v0, %v840_v2 }
 0x95b   :  { %845 = vrot.lane.b32.xlu1 %v2221_v5, %s1838_s27  ;;  %1147 = vrot.lane.b32.xlu2 %v2227_v3, %s1840_s28  ;;  %v1708_v54 = vpack.i.bf16 %v2221_v5, %v2227_v3 }
 0x95c   :  { %947 = vrot.lane.b32.xlu0 %v2227_v3, %s1837_s25  ;;  %s2494_s25 = smov 56  }
 0x963   :  { %1145 = vrot.lane.b32.xlu1 %v2221_v5, %s1840_s28  ;;  %1047 = vrot.lane.b32.xlu2 %v2227_v3, %s1843_s30  ;;  %s2497_s28 = smov 48  }
 0x964   :  { %847 = vrot.lane.b32.xlu0 %v2227_v3, %s1838_s27  ;;  %s2495_s27 = smov 64  }
 0x96b   :  { %1045 = vrot.lane.b32.xlu1 %v2221_v5, %s1843_s30  ;;  %1041 = vrot.lane.b32.xlu2 %v2221_v5, %s1844_s18  ;;  %s2498_s30 = smov 8  }
 0x96c   :  { %943 = vrot.lane.b32.xlu0 %v2227_v3, %s1839_s0  ;;  %s2496_s0 = smov 40  }
 0x973   :  { %1043 = vrot.lane.b32.xlu1 %v2227_v3, %s1844_s18  ;;  %s2499_s18 = smov 16  }
 0x974   :  { %1141 = vrot.lane.b32.xlu0 %v2221_v5, %s2493_s24 }
 0x97c   :  { %1143 = vrot.lane.b32.xlu0 %v2227_v3, %s2493_s24 }
 0x9ad   :  { %v942_v8 = vpop.permute.xlu2 %941 }
 0x9b5   :  { %v1148_v12 = vpop.permute.xlu2 %1147 }
 0x9bd   :  { %v1048_v15 = vpop.permute.xlu2 %1047 }
 0x9c5   :  { %v946_v7 = vpop.permute.xlu1 %945  ;;  %v1042_v19 = vpop.permute.xlu2 %1041 }
 0x9cd   :  { %v846_v9 = vpop.permute.xlu1 %845 }
 0x9ce   :  { %v948_v10 = vpop.permute.xlu0 %947 }
 0x9cf   :  { %1619 = vmatpush.xpose.msk.msrb.mxu3 %vm122_vm1, %v948_v10 }
 0x9d3   :  { %1620 = vmatpush.xpose.msk.msrb.mxu3 %vm122_vm1, %v946_v7 }
 0x9d5   :  { %v1146_v13 = vpop.permute.xlu1 %1145 }
 0x9d6   :  { %v848_v14 = vpop.permute.xlu0 %847  ;;  %1621 = vmatmul.msk.f32.vlgmr.msrb.gmra.mxu3 %vm122_vm1, %v942_v8 }
 0x9d7   :  { %1631 = vmatpush.xpose.msk.msra.mxu3 %vm122_vm1, %v1148_v12  ;;  %1613 = vmatpush.xpose.msk.msra.mxu0 %vm122_vm1, %v848_v14 }
 0x9db   :  { %1632 = vmatpush.xpose.msk.msra.mxu3 %vm122_vm1, %v1146_v13  ;;  %1614 = vmatpush.xpose.msk.msra.mxu0 %vm122_vm1, %v846_v9 }
 0x9dd   :  { %v1046_v16 = vpop.permute.xlu1 %1045 }
 0x9de   :  { %1615 = vmatmul.msk.f32.vlgmr.msra.gmra.mxu0 %vm122_vm1, %v2221_v5  ;;  %v944_v6 = vpop.permute.xlu0 %943 }
 0x9df   :  { %1625 = vmatpush.xpose.msk.msrb.mxu0 %vm122_vm1, %v1048_v15  ;;  %1622 = vmatmul.msk.f32.gmra.mxu3 %vm122_vm1, %v944_v6 }
 0x9e3   :  { %1626 = vmatpush.xpose.msk.msrb.mxu0 %vm122_vm1, %v1046_v16 }
 0x9e5   :  { %v1044_v22 = vpop.permute.xlu1 %1043 }
 0x9e6   :  { %1616 = vmatmul.msk.f32.gmra.mxu0 %vm122_vm1, %v2227_v3  ;;  %v1142_v17 = vpop.permute.xlu0 %1141 }
 0x9e7   :  { %1633 = vmatmul.msk.f32.vlgmr.msra.gmra.mxu3 %vm122_vm1, %v1142_v17 }
 0x9ee   :  { %v1144_v21 = vpop.permute.xlu0 %1143  ;;  %1627 = vmatmul.msk.f32.vlgmr.msrb.gmra.mxu0 %vm122_vm1, %v1042_v19 }
 0x9ef   :  { %1634 = vmatmul.msk.f32.gmra.mxu3 %vm122_vm1, %v1144_v21 }
 0x9f6   :  { %1628 = vmatmul.msk.f32.gmra.mxu0 %vm122_vm1, %v1044_v22 }
 0xa59   :  { %v974_v23 = vpop.f32.mrf.mxu3 }
 0xa5a   :  { %v980_v24 = vmul.f32 0.35355338, %v974_v23 }
 0xa5b   :  { %v874_v25 = vpop.f32.mrf.mxu0 }
 0xa5c   :  { %v880_v18 = vmul.f32 0.35355338, %v874_v25  ;;  %v982_v26 = vadd.f32 %v980_v24, %v2027_v31 }
 0xa5e   :  { %v984_v27 = vsel %vm158_vm3, %v982_v26, -inf  ;;  %v882_v28 = vadd.f32 %v880_v18, %v2027_v31 }
 0xa5f   :  { %985 = vmax.xlane.f32.xlu0 %v984_v27 }
 0xa60   :  { %v884_v29 = vsel %vm158_vm3, %v882_v28, -inf }
 0xa61   :  { %885 = vmax.xlane.f32.xlu2 %v884_v29 }
 0xa62   :  { %v977_v30 = vpop.f32.mrf.mxu3 }
 0xa63   :  { %v981_v32 = vmul.f32 0.35355338, %v977_v30  ;;  %v877_v33 = vpop.f32.mrf.mxu0 }
 0xa64   :  { %v881_v34 = vmul.f32 0.35355338, %v877_v33 }
 0xa65   :  { %v983_v35 = vadd.f32 %v981_v32, %v2043_v52 }
 0xa66   :  { %v883_v36 = vadd.f32 %v881_v34, %v2043_v52 }
 0xa67   :  { %v987_v37 = vsel %vm158_vm3, %v983_v35, -inf }
 0xa68   :  { %988 = vmax.xlane.f32.xlu1 %v987_v37  ;;  %v887_v38 = vsel %vm158_vm3, %v883_v36, -inf }
 0xa69   :  { %888 = vmax.xlane.f32.xlu2 %v887_v38 }
 0xa6a   :  { %v1174_v39 = vpop.f32.mrf.mxu3 }
 0xa6b   :  { %v1180_v40 = vmul.f32 0.35355338, %v1174_v39  ;;  %v1074_v41 = vpop.f32.mrf.mxu0 }
 0xa6c   :  { %v1080_v42 = vmul.f32 0.35355338, %v1074_v41 }
 0xa6d   :  { %v1182_v43 = vadd.f32 %v1180_v40, %v2027_v31 }
 0xa6e   :  { %v1082_v44 = vadd.f32 %v1080_v42, %v2027_v31 }
 0xa6f   :  { %v1184_v45 = vsel %vm158_vm3, %v1182_v43, -inf }
 0xa70   :  { %1185 = vmax.xlane.f32.xlu0 %v1184_v45  ;;  %v1084_v46 = vsel %vm158_vm3, %v1082_v44, -inf }
 0xa71   :  { %1085 = vmax.xlane.f32.xlu1 %v1084_v46 }
 0xa72   :  { %v1177_v47 = vpop.f32.mrf.mxu3 }
 0xa73   :  { %v1181_v20 = vmul.f32 0.35355338, %v1177_v47  ;;  %v1077_v48 = vpop.f32.mrf.mxu0 }
 0xa74   :  { %v1081_v49 = vmul.f32 0.35355338, %v1077_v48 }
 0xa75   :  { %v2284_v50 = vadd.f32 %v1181_v20, %v2043_v52 }
 0xa76   :  { %v1083_v51 = vadd.f32 %v1081_v49, %v2043_v52 }
 0xa77   :  { %v1187_v53 = vsel %vm158_vm3, %v2284_v50, -inf }
 0xa78   :  { %1188 = vmax.xlane.f32.xlu2 %v1187_v53  ;;  %v1087_v31 = vsel %vm158_vm3, %v1083_v51, -inf }
 0xa79   :  { %1088 = vmax.xlane.f32.xlu0 %v1087_v31 }
 0xa8d   :  { %1709 = vrot.lane.b32.xlu0 %v1708_v54, %s2494_s25 }
 0xad2   :  { %v986_v55 = vpop.xlane.xlu0 %985 }
 0xad3   :  { %v990_v56 = vsub.f32 %v982_v26, %v986_v55 }
 0xad4   :  { %v886_v57 = vpop.xlane.xlu2 %885 }
 0xad5   :  { %v992_v11 = vmul.f32 1.442695, %v990_v56  ;;  %v890_v59 = vsub.f32 %v882_v28, %v886_v57 }
 0xad7   :  { %1793 = vpow2.f32 %v992_v11  ;;  %v892_v60 = vmul.f32 1.442695, %v890_v59 }
 0xad9   :  { %1795 = vpow2.f32 %v892_v60 }
 0xadb   :  { %v989_v52 = vpop.xlane.xlu1 %988 }
 0xadc   :  { %v889_v61 = vpop.xlane.xlu2 %888  ;;  %v991_v7 = vsub.f32 %v983_v35, %v989_v52 }
 0xadd   :  { %v1794_v4 = vpop.eup %1793  ;;  %v891_v0 = vsub.f32 %v883_v36, %v889_v61 }
 0xade   :  { %v996_v1 = vsel %vm158_vm3, %v1794_v4, 0.0  ;;  %v994_v8 = vmul.f32 1.442695, %v991_v7 }
 0xadf   :  { %v2294_v2 = vpop.eup %1795  ;;  %v894_v5 = vmul.f32 1.442695, %v891_v0  ;;  %997 = vadd.xlane.f32.xlu1 %v996_v1 }
 0xae0   :  { %v896_v3 = vsel %vm158_vm3, %v2294_v2, 0.0 }
 0xae1   :  { %1797 = vpow2.f32 %v894_v5  ;;  %897 = vadd.xlane.f32.xlu2 %v896_v3 }
 0xae2   :  { %1799 = vpow2.f32 %v994_v8 }
 0xae3   :  { %v1186_v9 = vpop.xlane.xlu0 %1185 }
 0xae4   :  { %v1190_v10 = vsub.f32 %v1182_v43, %v1186_v9  ;;  %v1086_v12 = vpop.xlane.xlu1 %1085 }
 0xae5   :  { %v1090_v15 = vsub.f32 %v1082_v44, %v1086_v12 }
 0xae6   :  { %v1192_v13 = vmul.f32 1.442695, %v1190_v10 }
 0xae7   :  { %v1798_v14 = vpop.eup %1797  ;;  %v1092_v6 = vmul.f32 1.442695, %v1090_v15 }
 0xae8   :  { %1801 = vpow2.f32 %v1192_v13  ;;  %v899_v16 = vsel %vm158_vm3, %v1798_v14, 0.0  ;;  %v1800_v19 = vpop.eup %1799 }
 0xae9   :  { %900 = vadd.xlane.f32.xlu1 %v899_v16  ;;  %1803 = vpow2.f32 %v1092_v6  ;;  %v999_v25 = vsel %vm158_vm3, %v1800_v19, 0.0  ;;  %v1640_v6 = vld [vmem:[%s2462_s5 + $0x38] sm:$0xff] }
 0xaea   :  { %1299 = vmatpush.msra.mxu0 %v1640_v6 }
 0xaeb   :  { %v1189_v33 = vpop.xlane.xlu2 %1188 }
 0xaec   :  { %v1089_v17 = vpop.xlane.xlu0 %1088  ;;  %v1191_v34 = vsub.f32 %v2284_v50, %v1189_v33 }
 0xaed   :  { %v1091_v21 = vsub.f32 %v1083_v51, %v1089_v17  ;;  %v1639_v17 = vld [vmem:[%s2462_s5 + $0x30] sm:$0xff] }
 0xaee   :  { %v2299_v22 = vpop.eup %1801  ;;  %v1194_v35 = vmul.f32 1.442695, %v1191_v34  ;;  %1300 = vmatpush.msra.mxu0 %v1639_v17  ;;  %v1739_v34 = vld [vmem:[%s2463_s6 + $0x1] ss:$0 sm:$0xff] }
 0xaef   :  { %v1094_v23 = vmul.f32 1.442695, %v1091_v21  ;;  %v1196_v24 = vsel %vm158_vm3, %v2299_v22, 0.0  ;;  %v2304_v18 = vpop.eup %1803  ;;  %v1637_v21 = vld [vmem:[%s2462_s5 + $0x20] sm:$0xff] }
 0xaf0   :  { %1197 = vadd.xlane.f32.xlu0 %v1196_v24  ;;  %v1096_v28 = vsel %vm158_vm3, %v2304_v18, 0.0 }
 0xaf1   :  { %1805 = vpow2.f32 %v1094_v23  ;;  %1000 = vadd.xlane.f32.xlu1 %v999_v25 }
 0xaf2   :  { %1807 = vpow2.f32 %v1194_v35 }
 0xaf7   :  { %v2306_v26 = vpop.eup %1805 }
 0xaf8   :  { %v1099_v27 = vsel %vm158_vm3, %v2306_v26, 0.0  ;;  %v1808_v36 = vpop.eup %1807 }
 0xaf9   :  { %1100 = vadd.xlane.f32.xlu0 %v1099_v27  ;;  %1714 = vrot.lane.b32.xlu2 %v1708_v54, %s2495_s27  ;;  %v1199_v37 = vsel %vm158_vm3, %v1808_v36, 0.0 }
 0xafa   :  { %1097 = vadd.xlane.f32.xlu1 %v1096_v28 }
 0xaff   :  { %v1710_v29 = vpop.permute.xlu0 %1709 }
 0xb00   :  { %v1711_v30 = vunpack.i.l.bf16 %v1710_v29  ;;  %v1712_v32 = vunpack.i.h.bf16 %v1710_v29 }
 0xb02   :  { %1032 = vmatpush.msra.mxu2 %v1711_v30 }
 0xb04   :  { %1033 = vmatpush.msra.mxu2 %v1712_v32 }
 0xb13   :  { %1719 = vrot.lane.b32.xlu1 %v1708_v54, %s2496_s0 }
 0xb1b   :  { %1724 = vrot.lane.b32.xlu1 %v1708_v54, %s2497_s28 }
 0xb22   :  { %1200 = vadd.xlane.f32.xlu2 %v1199_v37 }
 0xb52   :  { %v998_v38 = vpop.xlane.xlu1 %997 }
 0xb53   :  { %1809 = vrcp.f32 %v998_v38 }
 0xb54   :  { %v898_v39 = vpop.xlane.xlu2 %897 }
 0xb55   :  { %1811 = vrcp.f32 %v898_v39 }
 0xb59   :  { %v1810_v40 = vpop.eup %1809 }
 0xb5a   :  { %v1004_v41 = vmul.f32 %v1810_v40, %v1794_v4 }
 0xb5b   :  { %v1812_v44 = vpop.eup %1811 }
 0xb5c   :  { %1623 = vmatmul.msk.f32.vlgmr.msra.gmra.mxu2 %vm158_vm3, %v1004_v41  ;;  %v901_v42 = vpop.xlane.xlu1 %900  ;;  %v1715_v43 = vpop.permute.xlu2 %1714  ;;  %v904_v47 = vmul.f32 %v1812_v44, %v2294_v2 }
 0xb5d   :  { %v1716_v45 = vunpack.i.l.bf16 %v1715_v43  ;;  %1813 = vrcp.f32 %v901_v42  ;;  %v1717_v46 = vunpack.i.h.bf16 %v1715_v43 }
 0xb5f   :  { %932 = vmatpush.msrb.mxu1 %v1716_v45 }
 0xb61   :  { %933 = vmatpush.msrb.mxu1 %v1717_v46 }
 0xb62   :  { %1617 = vmatmul.msk.f32.vlgmr.msrb.gmra.mxu1 %vm158_vm3, %v904_v47 }
 0xb63   :  { %v1814_v48 = vpop.eup %1813  ;;  %v1198_v53 = vpop.xlane.xlu0 %1197 }
 0xb64   :  { %v1001_v20 = vpop.xlane.xlu1 %1000  ;;  %v905_v49 = vmul.f32 %v1814_v48, %v1798_v14 }
 0xb65   :  { %1815 = vrcp.f32 %v1001_v20 }
 0xb66   :  { %1817 = vrcp.f32 %v1198_v53  ;;  %v1647_v53 = vld [vmem:[%s2467_s9 + $0x28] sm:$0xff] }
 0xb6a   :  { %1618 = vmatmul.msk.f32.gmra.mxu1 %vm158_vm3, %v905_v49 }
 0xb6b   :  { %v1816_v50 = vpop.eup %1815 }
 0xb6c   :  { %v1005_v51 = vmul.f32 %v1816_v50, %v1800_v19  ;;  %v1818_v55 = vpop.eup %1817  ;;  %v1101_v59 = vpop.xlane.xlu0 %1100  ;;  %v1638_v19 = vld [vmem:[%s2462_s5 + $0x28] sm:$0xff] }
 0xb6d   :  { %v1098_v31 = vpop.xlane.xlu1 %1097  ;;  %v1204_v11 = vmul.f32 %v1818_v55, %v2299_v22  ;;  %1301 = vmatpush.msra.mxu0 %v1638_v19 }
 0xb6e   :  { %1624 = vmatmul.msk.f32.gmra.mxu2 %vm158_vm3, %v1005_v51  ;;  %1819 = vrcp.f32 %v1098_v31  ;;  %v1648_v51 = vld [vmem:[%s2467_s9 + $0x30] sm:$0xff]  ;;  %v1646_v31 = vld [vmem:[%s2467_s9 + $0x20] sm:$0xff] }
 0xb6f   :  { %1821 = vrcp.f32 %v1101_v59  ;;  %1302 = vmatpush.msra.mxu0 %v1637_v21 }
 0xb74   :  { %v1820_v52 = vpop.eup %1819 }
 0xb75   :  { %v1104_v0 = vmul.f32 %v1820_v52, %v2304_v18  ;;  %v1822_v2 = vpop.eup %1821 }
 0xb76   :  { %v1105_v7 = vmul.f32 %v1822_v2, %v2306_v26 }
 0xb85   :  { %v1720_v54 = vpop.permute.xlu1 %1719 }
 0xb86   :  { %v1721_v56 = vunpack.i.l.bf16 %v1720_v54  ;;  %v1722_v57 = vunpack.i.h.bf16 %v1720_v54 }
 0xb88   :  { %1232 = vmatpush.msrb.mxu2 %v1721_v56 }
 0xb8a   :  { %1233 = vmatpush.msrb.mxu2 %v1722_v57 }
 0xb8b   :  { %1635 = vmatmul.msk.f32.vlgmr.msrb.gmra.mxu2 %vm158_vm3, %v1204_v11 }
 0xb8d   :  { %v1725_v60 = vpop.permute.xlu1 %1724 }
 0xb8e   :  { %v1726_v61 = vunpack.i.l.bf16 %v1725_v60  ;;  %v1727_v4 = vunpack.i.h.bf16 %v1725_v60 }
 0xb90   :  { %1132 = vmatpush.msra.mxu1 %v1726_v61 }
 0xb92   :  { %1133 = vmatpush.msra.mxu1 %v1727_v4 }
 0xb93   :  { %1629 = vmatmul.msk.f32.vlgmr.msra.gmra.mxu1 %vm158_vm3, %v1104_v0 }
 0xb95   :  { %v1201_v1 = vpop.xlane.xlu2 %1200 }
 0xb96   :  { %1823 = vrcp.f32 %v1201_v1 }
 0xb9b   :  { %1630 = vmatmul.msk.f32.gmra.mxu1 %vm158_vm3, %v1105_v7 }
 0xb9c   :  { %v1824_v5 = vpop.eup %1823 }
 0xb9d   :  { %v1205_v3 = vmul.f32 %v1824_v5, %v1808_v36  ;;  %v1740_v5 = vld [vmem:[%s2464_s7 + $0x1] ss:$0 sm:$0xff] }
 0xb9f   :  { %1636 = vmatmul.msk.f32.gmra.mxu2 %vm158_vm3, %v1205_v3 }
 0xbdf   :  { %v1035_v8 = vpop.f32.mrf.mxu2  ;;  %v935_v10 = vpop.f32.mrf.mxu1 }
 0xbe0   :  { %1243 = vrot.lane.b32.xlu1 %v1035_v8, %s2498_s30 }
 0xbe7   :  { %v938_v12 = vpop.f32.mrf.mxu1 }
 0xbf1   :  { %v1038_v9 = vpop.f32.mrf.mxu2 }
 0xbf2   :  { %1245 = vrot.lane.b32.xlu2 %v1038_v9, %s2498_s30 }
 0xc0e   :  { %v1235_v15 = vpop.f32.mrf.mxu2 }
 0xc10   :  { %v1135_v13 = vpop.f32.mrf.mxu1 }
 0xc11   :  { %1251 = vrot.lane.b32.xlu0 %v1135_v13, %s2499_s18 }
 0xc18   :  { %v1138_v14 = vpop.f32.mrf.mxu1 }
 0xc19   :  { %1253 = vrot.lane.b32.xlu1 %v1138_v14, %s2499_s18 }
 0xc21   :  { %1259 = vrot.lane.b32.xlu1 %v1235_v15, %s2500_s1 }
 0xc22   :  { %v1238_v16 = vpop.f32.mrf.mxu2 }
 0xc29   :  { %1261 = vrot.lane.b32.xlu1 %v1238_v16, %s2500_s1 }
 0xc4c   :  { %v1246_v28 = vpop.permute.xlu2 %1245 }
 0xc4d   :  { %v1266_v29 = vsel %vm122_vm1, %v938_v12, %v1246_v28  ;;  %v1653_v28 = vld [vmem:[%s2469_s11 + $0x40] sm:$0xff] }
 0xc52   :  { %v1244_v22 = vpop.permute.xlu1 %1243 }
 0xc53   :  { %v1265_v25 = vsel %vm122_vm1, %v935_v10, %v1244_v22  ;;  %v1741_v10 = vld [vmem:[%s2465_s8 + $0x1] ss:$0 sm:$0xff]  ;;  %v1660_v22 = vld [vmem:[%s2469_s11 + $0x78] sm:$0xff] }
 0xc54   :  { %1455 = vmatpush.msrb.mxu3 %v1660_v22 }
 0xc83   :  { %v1252_v24 = vpop.permute.xlu0 %1251 }
 0xc84   :  { %v1267_v18 = vsel %vm158_vm3, %v1265_v25, %v1252_v24  ;;  %v1658_v24 = vld [vmem:[%s2469_s11 + $0x68] sm:$0xff]  ;;  %v1657_v25 = vld [vmem:[%s2469_s11 + $0x60] sm:$0xff] }
 0xc8b   :  { %v1254_v23 = vpop.permute.xlu1 %1253 }
 0xc8c   :  { %v1268_v30 = vsel %vm158_vm3, %v1266_v29, %v1254_v23  ;;  %v1659_v23 = vld [vmem:[%s2469_s11 + $0x70] sm:$0xff]  ;;  %v1742_v29 = vld [vmem:[%s2466_s10 + $0x1] ss:$0 sm:$0xff] }
 0xc8d   :  { %1456 = vmatpush.msrb.mxu3 %v1659_v23 }
 0xc8f   :  { %1457 = vmatpush.msrb.mxu3 %v1658_v24 }
 0xc91   :  { %1458 = vmatpush.msrb.mxu3 %v1657_v25 }
 0xc93   :  { %v1260_v26 = vpop.permute.xlu1 %1259 }
 0xc94   :  { %v1269_v27 = vsel %vm544_vm5, %v1267_v18, %v1260_v26  ;;  %v1656_v18 = vld [vmem:[%s2469_s11 + $0x58] sm:$0xff]  ;;  %v1655_v26 = vld [vmem:[%s2469_s11 + $0x50] sm:$0xff] }
 0xc95   :  { %1642 = vmatmul.msk.f32.vlgmr.msra.gmra.mxu0 %vm86_vm0, %v1269_v27  ;;  %1459 = vmatpush.msrb.mxu3 %v1656_v18  ;;  %v1654_v27 = vld [vmem:[%s2469_s11 + $0x48] sm:$0xff] }
 0xc97   :  { %1460 = vmatpush.msrb.mxu3 %v1655_v26  ;;  %v1744_v26 = vld [vmem:[%s2470_s13 + $0x1] ss:$0 sm:$0xff] }
 0xc99   :  { %1461 = vmatpush.msrb.mxu3 %v1654_v27 }
 0xc9b   :  { %v1262_v32 = vpop.permute.xlu1 %1261  ;;  %1462 = vmatpush.msrb.mxu3 %v1653_v28 }
 0xc9c   :  { %v1270_v33 = vsel %vm544_vm5, %v1268_v30, %v1262_v32 }
 0xc9d   :  { %1643 = vmatmul.msk.f32.gmra.mxu0 %vm86_vm0, %v1270_v33 }
 0xd12   :  { %v1304_v35 = vpop.f32.mrf.mxu0 }
 0xd13   :  { %v1305_v36 = vadd.f32 %v1739_v34, %v1304_v35 }
 0xd15   :  { %v1310_v37 = vadd.f32 %v1305_v36, %v2210_v58 }
 0xd17   :  { %v1316_v38 = vsel %vm86_vm0, %v1310_v37, 0.0 }
 0xd18   :  { %1317 = vadd.xlane.f32.xlu0 %v1316_v38 }
 0xd1a   :  { %v1307_v39 = vpop.f32.mrf.mxu0 }
 0xd1b   :  { %v1308_v40 = vadd.f32 %v1739_v34, %v1307_v39 }
 0xd1d   :  { %v1311_v41 = vadd.f32 %v1308_v40, %v2214_v63  ;;  %v1649_v63 = vld [vmem:[%s2467_s9 + $0x38] sm:$0xff] }
 0xd1e   :  { %1398 = vmatpush.msrb.mxu1 %v1649_v63  ;;  %v1743_v63 = vld [vmem:[%s2468_s12 + $0x1] ss:$0 sm:$0xff] }
 0xd1f   :  { %v1319_v42 = vsel %vm86_vm0, %v1311_v41, 0.0 }
 0xd20   :  { %1320 = vadd.xlane.f32.xlu1 %v1319_v42  ;;  %1399 = vmatpush.msrb.mxu1 %v1648_v51 }
 0xd22   :  { %1400 = vmatpush.msrb.mxu1 %v1647_v53 }
 0xd24   :  { %1401 = vmatpush.msrb.mxu1 %v1646_v31 }
 0xd8b   :  { %v1318_v43 = vpop.xlane.xlu0 %1317 }
 0xd8c   :  { %v1322_v44 = vmul.f32 %v1318_v43, %v2124_v62 }
 0xd8e   :  { %v1324_v45 = vsub.f32 %v1310_v37, %v1322_v44 }
 0xd90   :  { %v1326_v46 = vmul.f32 %v1324_v45, %v1324_v45 }
 0xd92   :  { %v1328_v47 = vsel %vm86_vm0, %v1326_v46, 0.0 }
 0xd93   :  { %1329 = vadd.xlane.f32.xlu2 %v1328_v47  ;;  %v1321_v20 = vpop.xlane.xlu1 %1320 }
 0xd94   :  { %v1323_v58 = vmul.f32 %v1321_v20, %v2124_v62 }
 0xd96   :  { %v1325_v48 = vsub.f32 %v1311_v41, %v1323_v58 }
 0xd98   :  { %v1327_v49 = vmul.f32 %v1325_v48, %v1325_v48 }
 0xd9a   :  { %v1331_v50 = vsel %vm86_vm0, %v1327_v49, 0.0 }
 0xd9b   :  { %1332 = vadd.xlane.f32.xlu0 %v1331_v50 }
 0xe06   :  { %v1330_v54 = vpop.xlane.xlu2 %1329 }
 0xe07   :  { %v1334_v55 = vmul.f32 %v1330_v54, %v2124_v62 }
 0xe09   :  { %v1336_v56 = vadd.f32 1e-12, %v1334_v55 }
 0xe0b   :  { %1825 = vrsqrt.f32 %v1336_v56  ;;  %vm1344_vm3 = vweird.f32 %v1336_v56 }
 0xe0e   :  { %v1333_v57 = vpop.xlane.xlu0 %1332 }
 0xe0f   :  { %v1335_v11 = vmul.f32 %v1333_v57, %v2124_v62 }
 0xe11   :  { %v1826_v59 = vpop.eup %1825  ;;  %v1337_v60 = vadd.f32 1e-12, %v1335_v11 }
 0xe12   :  { %v1339_v52 = vmul.f32 %v1826_v59, %v1336_v56  ;;  %vm1345_vm1 = vweird.f32 %v1826_v59 }
 0xe13   :  { %1827 = vrsqrt.f32 %v1337_v60  ;;  %vm1346_vm5 = vmor %vm1344_vm3, %vm1345_vm1  ;;  %vm1354_vm9 = vweird.f32 %v1337_v60 }
 0xe14   :  { %v1340_v61 = vmul.f32 %v1826_v59, %v1339_v52 }
 0xe16   :  { %v1341_v4 = vmul.f32 0.5, %v1340_v61 }
 0xe18   :  { %v1342_v0 = vsub.f32 1.5, %v1341_v4 }
 0xe19   :  { %v1828_v1 = vpop.eup %1827 }
 0xe1a   :  { %v1343_v2 = vmul.f32 %v1826_v59, %v1342_v0  ;;  %v1349_v7 = vmul.f32 %v1828_v1, %v1337_v60  ;;  %vm1355_vm8 = vweird.f32 %v1828_v1 }
 0xe1b   :  { %vm1356_vm10 = vmor %vm1354_vm9, %vm1355_vm8 }
 0xe1c   :  { %v1347_v3 = vsel %vm1346_vm5, %v1826_v59, %v1343_v2  ;;  %v1350_v8 = vmul.f32 %v1828_v1, %v1349_v7 }
 0xe1d   :  { %v1358_v9 = vmul.f32 %v1347_v3, %v1324_v45  ;;  %v1533_v3 = vld [vmem:[%s2473_s15 + $0x18] sm:$0xff] }
 0xe1e   :  { %v1351_v12 = vmul.f32 0.5, %v1350_v8  ;;  %1556 = vmatpush.msra.mxu2 %v1533_v3  ;;  %v1532_v8 = vld [vmem:[%s2473_s15 + $0x10] sm:$0xff] }
 0xe1f   :  { %v1363_v13 = vmul.f32 %v1740_v5, %v1358_v9  ;;  %v1531_v9 = vld [vmem:[%s2473_s15 + $0x8] sm:$0xff] }
 0xe20   :  { %v1352_v14 = vsub.f32 1.5, %v1351_v12  ;;  %1557 = vmatpush.msra.mxu2 %v1532_v8 }
 0xe21   :  { %v1368_v15 = vadd.f32 %v1741_v10, %v1363_v13 }
 0xe22   :  { %v1353_v16 = vmul.f32 %v1828_v1, %v1352_v14  ;;  %1558 = vmatpush.msra.mxu2 %v1531_v9 }
 0xe23   :  { %1651 = vmatmul.msk.f32.vlgmr.msrb.gmra.mxu1 %vm86_vm0, %v1368_v15 }
 0xe24   :  { %v1357_v6 = vsel %vm1356_vm10, %v1828_v1, %v1353_v16 }
 0xe25   :  { %v1359_v17 = vmul.f32 %v1357_v6, %v1325_v48 }
 0xe27   :  { %v1364_v19 = vmul.f32 %v1740_v5, %v1359_v17 }
 0xe29   :  { %v1369_v21 = vadd.f32 %v1741_v10, %v1364_v19  ;;  %v1530_v10 = vld [vmem:[%s2473_s15] sm:$0xff] }
 0xe2a   :  { %1559 = vmatpush.msra.mxu2 %v1530_v10 }
 0xe2b   :  { %1652 = vmatmul.msk.f32.gmra.mxu1 %vm86_vm0, %v1369_v21 }
 0xea0   :  { %v1403_v30 = vpop.f32.mrf.mxu1 }
 0xea1   :  { %v1404_v32 = vadd.f32 %v1742_v29, %v1403_v30 }
 0xea3   :  { %v1409_v33 = vmul.f32 %v1404_v32, %v1404_v32 }
 0xea5   :  { %v1411_v34 = vmul.f32 %v1409_v33, %v1404_v32 }
 0xea7   :  { %v1413_v35 = vmul.f32 0.044715, %v1411_v34 }
 0xea8   :  { %v1406_v36 = vpop.f32.mrf.mxu1 }
 0xea9   :  { %v1415_v37 = vadd.f32 %v1413_v35, %v1404_v32  ;;  %v1407_v38 = vadd.f32 %v1742_v29, %v1406_v36  ;;  %v1745_v29 = vld [vmem:[%s2471_s14 + $0x1] ss:$0 sm:$0xff] }
 0xeab   :  { %v1417_v39 = vmul.f32 0.7978846, %v1415_v37  ;;  %v1410_v40 = vmul.f32 %v1407_v38, %v1407_v38 }
 0xead   :  { %1829 = vtanh.f32 %v1417_v39  ;;  %v1412_v41 = vmul.f32 %v1410_v40, %v1407_v38  ;;  %v1746_v40 = vld [vmem:[%s2472_s16] ss:$0 sm:$0xff] }
 0xeaf   :  { %v1414_v42 = vmul.f32 0.044715, %v1412_v41 }
 0xeb1   :  { %v1416_v43 = vadd.f32 %v1414_v42, %v1407_v38 }
 0xeb3   :  { %v1830_v44 = vpop.eup %1829  ;;  %v1418_v45 = vmul.f32 0.7978846, %v1416_v43 }
 0xeb4   :  { %v1421_v46 = vadd.f32 1.0, %v1830_v44 }
 0xeb5   :  { %1831 = vtanh.f32 %v1418_v45 }
 0xeb6   :  { %v1423_v47 = vmul.f32 0.5, %v1421_v46 }
 0xeb8   :  { %v1425_v20 = vmul.f32 %v1423_v47, %v1404_v32 }
 0xeba   :  { %1662 = vmatmul.msk.f32.vlgmr.msrb.gmra.mxu3 %vm716_vm13, %v1425_v20 }
 0xebb   :  { %v1832_v58 = vpop.eup %1831 }
 0xebc   :  { %v1422_v48 = vadd.f32 1.0, %v1832_v58 }
 0xebe   :  { %v1424_v49 = vmul.f32 0.5, %v1422_v48 }
 0xec0   :  { %v1426_v50 = vmul.f32 %v1424_v49, %v1407_v38 }
 0xec2   :  { %1663 = vmatmul.msk.f32.gmra.mxu3 %vm716_vm13, %v1426_v50 }
 0xf3d   :  { %v1464_v51 = vpop.f32.mrf.mxu3 }
 0xf3e   :  { %v1465_v53 = vadd.f32 %v1743_v63, %v1464_v51 }
 0xf40   :  { %v1470_v31 = vadd.f32 %v1465_v53, %v1368_v15 }
 0xf42   :  { %v1476_v54 = vsel %vm86_vm0, %v1470_v31, 0.0 }
 0xf43   :  { %1477 = vadd.xlane.f32.xlu2 %v1476_v54 }
 0xf45   :  { %v1467_v55 = vpop.f32.mrf.mxu3 }
 0xf46   :  { %v1468_v56 = vadd.f32 %v1743_v63, %v1467_v55 }
 0xf48   :  { %v1471_v57 = vadd.f32 %v1468_v56, %v1369_v21 }
 0xf4a   :  { %v1479_v11 = vsel %vm86_vm0, %v1471_v57, 0.0 }
 0xf4b   :  { %1480 = vadd.xlane.f32.xlu1 %v1479_v11 }
 0xfb6   :  { %v1478_v59 = vpop.xlane.xlu2 %1477 }
 0xfb7   :  { %v1482_v60 = vmul.f32 %v1478_v59, %v2124_v62 }
 0xfb9   :  { %v1484_v52 = vsub.f32 %v1470_v31, %v1482_v60 }
 0xfbb   :  { %v1486_v61 = vmul.f32 %v1484_v52, %v1484_v52 }
 0xfbd   :  { %v1488_v4 = vsel %vm86_vm0, %v1486_v61, 0.0 }
 0xfbe   :  { %1489 = vadd.xlane.f32.xlu0 %v1488_v4  ;;  %v1481_v0 = vpop.xlane.xlu1 %1480 }
 0xfbf   :  { %v1483_v1 = vmul.f32 %v1481_v0, %v2124_v62 }
 0xfc1   :  { %v1485_v2 = vsub.f32 %v1471_v57, %v1483_v1 }
 0xfc3   :  { %v1487_v7 = vmul.f32 %v1485_v2, %v1485_v2 }
 0xfc5   :  { %v1491_v5 = vsel %vm86_vm0, %v1487_v7, 0.0 }
 0xfc6   :  { %1492 = vadd.xlane.f32.xlu2 %v1491_v5 }
0x1031   :  { %v1490_v12 = vpop.xlane.xlu0 %1489 }
0x1032   :  { %v1494_v13 = vmul.f32 %v1490_v12, %v2124_v62 }
0x1034   :  { %v1496_v14 = vadd.f32 1e-12, %v1494_v13 }
0x1036   :  { %1833 = vrsqrt.f32 %v1496_v14  ;;  %vm1504_vm12 = vweird.f32 %v1496_v14 }
0x1039   :  { %v1493_v15 = vpop.xlane.xlu2 %1492 }
0x103a   :  { %v1495_v16 = vmul.f32 %v1493_v15, %v2124_v62 }
0x103c   :  { %v1834_v6 = vpop.eup %1833  ;;  %v1497_v17 = vadd.f32 1e-12, %v1495_v16 }
0x103d   :  { %v1499_v19 = vmul.f32 %v1834_v6, %v1496_v14  ;;  %vm1505_vm11 = vweird.f32 %v1834_v6 }
0x103e   :  { %1835 = vrsqrt.f32 %v1497_v17  ;;  %vm1506_vm13 = vmor %vm1504_vm12, %vm1505_vm11  ;;  %vm1514_vm15 = vweird.f32 %v1497_v17 }
0x103f   :  { %v1500_v21 = vmul.f32 %v1834_v6, %v1499_v19 }
0x1041   :  { %v1501_v22 = vmul.f32 0.5, %v1500_v21 }
0x1043   :  { %v1502_v23 = vsub.f32 1.5, %v1501_v22 }
0x1044   :  { %v1836_v24 = vpop.eup %1835 }
0x1045   :  { %v1503_v25 = vmul.f32 %v1834_v6, %v1502_v23  ;;  %v1509_v18 = vmul.f32 %v1836_v24, %v1497_v17  ;;  %vm1515_vm14 = vweird.f32 %v1836_v24 }
0x1046   :  { %vm1516_vm2 = vmor %vm1514_vm15, %vm1515_vm14 }
0x1047   :  { %v1507_v27 = vsel %vm1506_vm13, %v1834_v6, %v1503_v25  ;;  %v1510_v28 = vmul.f32 %v1836_v24, %v1509_v18 }
0x1048   :  { %v1518_v62 = vmul.f32 %v1507_v27, %v1484_v52 }
0x1049   :  { %v1511_v30 = vmul.f32 0.5, %v1510_v28 }
0x104a   :  { %v1523_v32 = vmul.f32 %v1744_v26, %v1518_v62 }
0x104b   :  { %v1512_v33 = vsub.f32 1.5, %v1511_v30 }
0x104c   :  { %v1528_v34 = vadd.f32 %v1745_v29, %v1523_v32 }
0x104d   :  { %v1513_v35 = vmul.f32 %v1836_v24, %v1512_v33 }
0x104e   :  { %1666 = vmatmul.msk.f32.vlgmr.msra.gmra.mxu2 %vm86_vm0, %v1528_v34 }
0x104f   :  { %v1517_v36 = vsel %vm1516_vm2, %v1836_v24, %v1513_v35 }
0x1050   :  { %v1519_v37 = vmul.f32 %v1517_v36, %v1485_v2 }
0x1052   :  { %v1524_v38 = vmul.f32 %v1744_v26, %v1519_v37 }
0x1054   :  { %v1529_v39 = vadd.f32 %v1745_v29, %v1524_v38 }
0x1056   :  { %1667 = vmatmul.msk.f32.gmra.mxu2 %vm86_vm0, %v1529_v39 }
0x10d1   :  { %v1561_v41 = vpop.f32.mrf.mxu2 }
0x10d2   :  { %v1562_v42 = vadd.f32 %v1746_v40, %v1561_v41 }
0x10d4   :  { %1568 = vst.msk [vmem:[%s2474_s17] sm:$0xff] %vm1567_vm4, %v1562_v42 }
0x10d9   :  { %v1564_v43 = vpop.f32.mrf.mxu2 }
0x10da   :  { %v1565_v44 = vadd.f32 %v1746_v40, %v1564_v43 }
0x10dc   :  { %1569 = vst.msk [vmem:[%s2474_s17 + $0x8] sm:$0xff] %vm1567_vm4, %v1565_v44 }

</bundles_post_ra>
